<compile_context>
chip_gen: v5e
topology: v5e:2x2
jax: 0.10.0
libtpu: 0.0.40
codegen_flags: <defaults>
</compile_context>

<pallas_src>
import functools
import math

import jax
import jax.numpy as jnp
from jax import lax
from jax.experimental import pallas as pl
from jax.experimental.pallas import tpu as pltpu


def _chunk_kernel(x0_ref, w_obs_ref, b_obs_ref, w_pol_ref, b_pol_ref,
                  w_trans_ref, traj_ref, state_ref, *, chunk, unroll):
    """One grid step == `chunk` substeps for one agent block.

    Grid = (agent_blocks [parallel], episodes [arbitrary], chunks [arbitrary]).
    The live simulation state for this agent block is carried in `state_ref`
    (the final-state output block, resident in VMEM across the episode/chunk
    axes because its index_map depends only on the agent-block axis).
    """
    e = pl.program_id(1)
    c = pl.program_id(2)

    # Runner.init(): load the initial state once per agent block, before the
    # first substep of the first episode.
    @pl.when((e == 0) & (c == 0))
    def _():
        state_ref[...] = x0_ref[...]

    def substep(t, x):
        # controller.observe(state, observation_function, agent_type)
        obs = jnp.maximum(
            jnp.dot(x.astype(jnp.bfloat16), w_obs_ref[...],
                    preferred_element_type=jnp.float32) + b_obs_ref[...],
            0.0,
        )
        # controller.act(state, observation, policy_function, agent_type)
        act = jnp.tanh(
            jnp.dot(obs.astype(jnp.bfloat16), w_pol_ref[...],
                    preferred_element_type=jnp.float32) + b_pol_ref[...]
        )
        # controller.progress(state, action, transition_function)
        x = x + jnp.dot(act.astype(jnp.bfloat16), w_trans_ref[...],
                        preferred_element_type=jnp.float32)
        # state_trajectory[-1].append(state)
        traj_ref[0, t] = x
        return x

    def body(i, x):
        # Small static inner unroll: LLO scheduler visibility without pinning
        # the whole chain's temporaries / weights in vregs.
        for j in range(unroll):
            x = substep(i * unroll + j, x)
        return x

    x = lax.fori_loop(0, chunk // unroll, body, state_ref[...])
    state_ref[...] = x


@functools.partial(jax.jit,
                   static_argnames=("num_episodes", "num_steps",
                                    "num_substeps", "block_agents", "chunk"))
def run_simulation(state0, w_obs, b_obs, w_pol, b_pol, w_trans,
                   *, num_episodes, num_steps, num_substeps,
                   block_agents=128, chunk=None):
    """Runner.forward(): all episodes in one pallas_call.

    Returns (trajectories, final_state) with
      trajectories: (num_episodes, num_steps*num_substeps, num_agents, hidden)
      final_state : (num_agents, hidden)
    """
    num_agents, hidden = state0.shape
    total = num_steps * num_substeps

    # Agent blocking: agents on sublanes, 128 rows per block fills the MXU on
    # v5e and gives v7x's second TensorCore independent "parallel" work.
    block_agents = min(block_agents, num_agents)
    assert num_agents % block_agents == 0, "num_agents must tile by block"
    num_agent_blocks = num_agents // block_agents

    # Step chunking: keep the double-buffered trajectory tile small and
    # independent of episode length.
    if chunk is None:
        chunk = min(total, 8)
    while total % chunk:
        chunk -= 1
    num_chunks = total // chunk
    unroll = math.gcd(chunk, 4)

    # bf16 weights: native MXU input dtype; halves weight VMEM/DMA bytes.
    w_obs_b = w_obs.astype(jnp.bfloat16)
    w_pol_b = w_pol.astype(jnp.bfloat16)
    w_trans_b = w_trans.astype(jnp.bfloat16)

    const = lambda a, e, c: (0, 0)   # weights / biases: same block always

    kernel = functools.partial(_chunk_kernel, chunk=chunk, unroll=unroll)

    traj, final_state = pl.pallas_call(
        kernel,
        out_shape=(
            jax.ShapeDtypeStruct((num_episodes, total, num_agents, hidden),
                                 jnp.float32),
            jax.ShapeDtypeStruct((num_agents, hidden), jnp.float32),
        ),
        grid_spec=pltpu.PrefetchScalarGridSpec(
            num_scalar_prefetch=0,
            grid=(num_agent_blocks, num_episodes, num_chunks),
            in_specs=[
                pl.BlockSpec((block_agents, hidden),
                             lambda a, e, c: (a, 0)),         # state0 (per blk)
                pl.BlockSpec((hidden, hidden), const),        # W_obs (bf16)
                pl.BlockSpec((1, hidden), const),             # b_obs
                pl.BlockSpec((hidden, hidden), const),        # W_pol (bf16)
                pl.BlockSpec((1, hidden), const),             # b_pol
                pl.BlockSpec((hidden, hidden), const),        # W_trans (bf16)
            ],
            out_specs=[
                pl.BlockSpec((1, chunk, block_agents, hidden),
                             lambda a, e, c: (e, c, a, 0)),   # traj chunk
                pl.BlockSpec((block_agents, hidden),
                             lambda a, e, c: (a, 0)),         # live/final state
            ],
        ),
        compiler_params=pltpu.CompilerParams(
            # agent blocks are independent -> "parallel" (megacore / v7x);
            # episodes & step-chunks carry state sequentially -> "arbitrary".
            dimension_semantics=("parallel", "arbitrary", "arbitrary"),
            vmem_limit_bytes=32 * 1024 * 1024,
        ),
    )(state0, w_obs_b, b_obs, w_pol_b, b_pol, w_trans_b)
    return traj, final_state


def runner_forward(state0, params, *, num_episodes, num_steps, num_substeps):
    """Runner.forward(): run all episodes; return per-episode trajectories."""
    w_obs, b_obs, w_pol, b_pol, w_trans = params
    traj, final_state = run_simulation(
        state0, w_obs, b_obs, w_pol, b_pol, w_trans,
        num_episodes=num_episodes, num_steps=num_steps,
        num_substeps=num_substeps)
    return [traj[ep] for ep in range(num_episodes)], final_state


def _reference_forward(state0, params, num_episodes, num_steps, num_substeps):
    """Pure-JAX reference mirroring the kernel's bf16-input / f32-accum math."""
    w_obs, b_obs, w_pol, b_pol, w_trans = params
    w_obs_b = w_obs.astype(jnp.bfloat16)
    w_pol_b = w_pol.astype(jnp.bfloat16)
    w_trans_b = w_trans.astype(jnp.bfloat16)
    x = state0
    episodes = []
    for _ in range(num_episodes):
        out = []
        for _ in range(num_steps * num_substeps):
            obs = jnp.maximum(
                jnp.dot(x.astype(jnp.bfloat16), w_obs_b,
                        preferred_element_type=jnp.float32) + b_obs, 0.0)
            act = jnp.tanh(
                jnp.dot(obs.astype(jnp.bfloat16), w_pol_b,
                        preferred_element_type=jnp.float32) + b_pol)
            x = x + jnp.dot(act.astype(jnp.bfloat16), w_trans_b,
                            preferred_element_type=jnp.float32)
            out.append(x)
        episodes.append(jnp.stack(out))
    return episodes, x


if __name__ == "__main__":
    # config['simulation_metadata']
    NUM_EPISODES = 2
    NUM_STEPS_PER_EPISODE = 4
    NUM_SUBSTEPS_PER_STEP = 2

    NUM_AGENTS = 256   # 2 agent blocks of 128: fills MXU rows, feeds 2 TCs
    HIDDEN = 128       # lane-aligned (use 256 on v6e/v7x for full MXU tiles)

    key = jax.random.PRNGKey(0)
    k0, k1, k2, k3, k4, k5 = jax.random.split(key, 6)

    # Initializer.initialize(): deterministic synthetic state + parameters.
    state0 = jax.random.normal(k0, (NUM_AGENTS, HIDDEN), jnp.float32)
    scale = 0.05
    w_obs = scale * jax.random.normal(k1, (HIDDEN, HIDDEN), jnp.float32)
    b_obs = scale * jax.random.normal(k2, (1, HIDDEN), jnp.float32)
    w_pol = scale * jax.random.normal(k3, (HIDDEN, HIDDEN), jnp.float32)
    b_pol = scale * jax.random.normal(k4, (1, HIDDEN), jnp.float32)
    w_trans = scale * jax.random.normal(k5, (HIDDEN, HIDDEN), jnp.float32)
    params = (w_obs, b_obs, w_pol, b_pol, w_trans)

    trajectories, final_state = runner_forward(
        state0, params,
        num_episodes=NUM_EPISODES,
        num_steps=NUM_STEPS_PER_EPISODE,
        num_substeps=NUM_SUBSTEPS_PER_STEP,
    )
    trajectories = [jax.block_until_ready(t) for t in trajectories]
    final_state = jax.block_until_ready(final_state)

    # Correctness check vs. pure-JAX reference (same bf16/f32 math).
    ref_trajs, ref_final = _reference_forward(
        state0, params, NUM_EPISODES, NUM_STEPS_PER_EPISODE,
        NUM_SUBSTEPS_PER_STEP)
    for ep in range(NUM_EPISODES):
        err = jnp.max(jnp.abs(trajectories[ep] - ref_trajs[ep]))
        assert jnp.allclose(trajectories[ep], ref_trajs[ep],
                            atol=1e-3, rtol=1e-3), (
            f"episode {ep} mismatch: {err}")
    assert jnp.allclose(final_state, ref_final, atol=1e-3, rtol=1e-3), (
        f"final state mismatch: {jnp.max(jnp.abs(final_state - ref_final))}")

    print("KERNEL_OK")
</pallas_src>

<mosaic_0001>
module attributes {stable_mosaic.version = 11 : i64} {
  func.func @_chunk_kernel(%arg0: i32, %arg1: i32, %arg2: i32, %arg3: memref<128x128xf32, #tpu.memory_space<vmem>>, %arg4: memref<128x128xbf16, #tpu.memory_space<vmem>>, %arg5: memref<1x128xf32, #tpu.memory_space<vmem>>, %arg6: memref<128x128xbf16, #tpu.memory_space<vmem>>, %arg7: memref<1x128xf32, #tpu.memory_space<vmem>>, %arg8: memref<128x128xbf16, #tpu.memory_space<vmem>>, %arg9: memref<1x8x128x128xf32, #tpu.memory_space<vmem>>, %arg10: memref<128x128xf32, #tpu.memory_space<vmem>>) attributes {dimension_semantics = [#tpu.dimension_semantics<parallel>, #tpu.dimension_semantics<arbitrary>, #tpu.dimension_semantics<arbitrary>], iteration_bounds = array<i64: 2, 2, 1>, scalar_prefetch = 0 : i64, scratch_operands = 0 : i64, tpu.core_type = #tpu.core_type<tc>, window_params = [{transform_indices = @transform_0, window_bounds = array<i64: 128, 128>}, {pipeline_mode = #tpu.pipeline_mode<synchronous>, transform_indices = @transform_1, window_bounds = array<i64: 128, 128>}, {pipeline_mode = #tpu.pipeline_mode<synchronous>, transform_indices = @transform_2, window_bounds = array<i64: 1, 128>}, {pipeline_mode = #tpu.pipeline_mode<synchronous>, transform_indices = @transform_3, window_bounds = array<i64: 128, 128>}, {pipeline_mode = #tpu.pipeline_mode<synchronous>, transform_indices = @transform_4, window_bounds = array<i64: 1, 128>}, {pipeline_mode = #tpu.pipeline_mode<synchronous>, transform_indices = @transform_5, window_bounds = array<i64: 128, 128>}, {transform_indices = @transform_6, window_bounds = array<i64: 1, 8, 128, 128>}, {transform_indices = @transform_7, window_bounds = array<i64: 128, 128>}]} {
    %c0_i32 = arith.constant 0 : i32
    %0 = arith.cmpi eq, %arg1, %c0_i32 : i32
    %c0_i32_0 = arith.constant 0 : i32
    %1 = arith.cmpi eq, %arg2, %c0_i32_0 : i32
    %2 = arith.andi %0, %1 : i1
    %3 = arith.extui %2 : i1 to i32
    %c0_i32_1 = arith.constant 0 : i32
    %4 = arith.cmpi ne, %3, %c0_i32_1 : i32
    scf.if %4 {
      %c0_7 = arith.constant 0 : index
      %c0_8 = arith.constant 0 : index
      %9 = vector.load %arg3[%c0_7, %c0_8] : memref<128x128xf32, #tpu.memory_space<vmem>>, vector<128x128xf32>
      %c0_9 = arith.constant 0 : index
      %c0_10 = arith.constant 0 : index
      %10 = vector.load %arg10[%c0_9, %c0_10] : memref<128x128xf32, #tpu.memory_space<vmem>>, vector<128x128xf32>
      tpu.vector_store %arg10[%c0_9, %c0_10], %9 {strides = array<i32>} : memref<128x128xf32, #tpu.memory_space<vmem>>, vector<128x128xf32>,
    } else {
    }
    %c0 = arith.constant 0 : index
    %c0_2 = arith.constant 0 : index
    %5 = vector.load %arg10[%c0, %c0_2] : memref<128x128xf32, #tpu.memory_space<vmem>>, vector<128x128xf32>
    %c0_i32_3 = arith.constant 0 : i32
    %c2_i32 = arith.constant 2 : i32
    %6 = arith.addi %c0_i32_3, %c2_i32 : i32
    %c1_i32 = arith.constant 1 : i32
    %7 = scf.for %arg11 = %c0_i32_3 to %6 step %c1_i32 iter_args(%arg12 = %5) -> (vector<128x128xf32>)  : i32 {
      %c4_i32 = arith.constant 4 : i32
      %9 = arith.muli %arg11, %c4_i32 : i32
      %c0_i32_7 = arith.constant 0 : i32
      %10 = arith.addi %9, %c0_i32_7 : i32
      %11 = arith.truncf %arg12 : vector<128x128xf32> to vector<128x128xbf16>
      %c0_8 = arith.constant 0 : index
      %c0_9 = arith.constant 0 : index
      %12 = vector.load %arg4[%c0_8, %c0_9] : memref<128x128xbf16, #tpu.memory_space<vmem>>, vector<128x128xbf16>
      %cst = arith.constant dense<0.000000e+00> : vector<128x128xf32>
      %13 = tpu.matmul %11, %12, %cst {dimension_numbers = #tpu.dot_dimension_numbers<[1], [0], [0], [1], [0, 0, 1, 1], [], []>} : vector<128x128xbf16>, vector<128x128xbf16>, vector<128x128xf32> -> vector<128x128xf32>
      %c0_10 = arith.constant 0 : index
      %c0_11 = arith.constant 0 : index
      %14 = vector.load %arg5[%c0_10, %c0_11] : memref<1x128xf32, #tpu.memory_space<vmem>>, vector<1x128xf32>
      %15 = vector.broadcast %14 : vector<1x128xf32> to vector<128x128xf32>
      %16 = arith.addf %13, %15 : vector<128x128xf32>
      %cst_12 = arith.constant 0.000000e+00 : f32
      %17 = vector.broadcast %cst_12 : f32 to vector<128x128xf32>
      %18 = arith.maximumf %16, %17 : vector<128x128xf32>
      %19 = arith.truncf %18 : vector<128x128xf32> to vector<128x128xbf16>
      %c0_13 = arith.constant 0 : index
      %c0_14 = arith.constant 0 : index
      %20 = vector.load %arg6[%c0_13, %c0_14] : memref<128x128xbf16, #tpu.memory_space<vmem>>, vector<128x128xbf16>
      %cst_15 = arith.constant dense<0.000000e+00> : vector<128x128xf32>
      %21 = tpu.matmul %19, %20, %cst_15 {dimension_numbers = #tpu.dot_dimension_numbers<[1], [0], [0], [1], [0, 0, 1, 1], [], []>} : vector<128x128xbf16>, vector<128x128xbf16>, vector<128x128xf32> -> vector<128x128xf32>
      %c0_16 = arith.constant 0 : index
      %c0_17 = arith.constant 0 : index
      %22 = vector.load %arg7[%c0_16, %c0_17] : memref<1x128xf32, #tpu.memory_space<vmem>>, vector<1x128xf32>
      %23 = vector.broadcast %22 : vector<1x128xf32> to vector<128x128xf32>
      %24 = arith.addf %21, %23 : vector<128x128xf32>
      %25 = math.tanh %24 : vector<128x128xf32>
      %26 = arith.truncf %25 : vector<128x128xf32> to vector<128x128xbf16>
      %c0_18 = arith.constant 0 : index
      %c0_19 = arith.constant 0 : index
      %27 = vector.load %arg8[%c0_18, %c0_19] : memref<128x128xbf16, #tpu.memory_space<vmem>>, vector<128x128xbf16>
      %cst_20 = arith.constant dense<0.000000e+00> : vector<128x128xf32>
      %28 = tpu.matmul %26, %27, %cst_20 {dimension_numbers = #tpu.dot_dimension_numbers<[1], [0], [0], [1], [0, 0, 1, 1], [], []>} : vector<128x128xbf16>, vector<128x128xbf16>, vector<128x128xf32> -> vector<128x128xf32>
      %29 = arith.addf %arg12, %28 : vector<128x128xf32>
      %c0_21 = arith.constant 0 : index
      %30 = arith.index_cast %10 : i32 to index
      %c0_22 = arith.constant 0 : index
      %c0_23 = arith.constant 0 : index
      %31 = vector.load %arg9[%c0_21, %30, %c0_22, %c0_23] : memref<1x8x128x128xf32, #tpu.memory_space<vmem>>, vector<1x1x128x128xf32>
      %32 = vector.shape_cast %31 : vector<1x1x128x128xf32> to vector<128x128xf32>
      %33 = vector.shape_cast %29 : vector<128x128xf32> to vector<1x1x128x128xf32>
      tpu.vector_store %arg9[%c0_21, %30, %c0_22, %c0_23], %33 {strides = array<i32>} : memref<1x8x128x128xf32, #tpu.memory_space<vmem>>, vector<1x1x128x128xf32>,
      %c4_i32_24 = arith.constant 4 : i32
      %34 = arith.muli %arg11, %c4_i32_24 : i32
      %c1_i32_25 = arith.constant 1 : i32
      %35 = arith.addi %34, %c1_i32_25 : i32
      %36 = arith.truncf %29 : vector<128x128xf32> to vector<128x128xbf16>
      %c0_26 = arith.constant 0 : index
      %c0_27 = arith.constant 0 : index
      %37 = vector.load %arg4[%c0_26, %c0_27] : memref<128x128xbf16, #tpu.memory_space<vmem>>, vector<128x128xbf16>
      %cst_28 = arith.constant dense<0.000000e+00> : vector<128x128xf32>
      %38 = tpu.matmul %36, %37, %cst_28 {dimension_numbers = #tpu.dot_dimension_numbers<[1], [0], [0], [1], [0, 0, 1, 1], [], []>} : vector<128x128xbf16>, vector<128x128xbf16>, vector<128x128xf32> -> vector<128x128xf32>
      %c0_29 = arith.constant 0 : index
      %c0_30 = arith.constant 0 : index
      %39 = vector.load %arg5[%c0_29, %c0_30] : memref<1x128xf32, #tpu.memory_space<vmem>>, vector<1x128xf32>
      %40 = vector.broadcast %39 : vector<1x128xf32> to vector<128x128xf32>
      %41 = arith.addf %38, %40 : vector<128x128xf32>
      %cst_31 = arith.constant 0.000000e+00 : f32
      %42 = vector.broadcast %cst_31 : f32 to vector<128x128xf32>
      %43 = arith.maximumf %41, %42 : vector<128x128xf32>
      %44 = arith.truncf %43 : vector<128x128xf32> to vector<128x128xbf16>
      %c0_32 = arith.constant 0 : index
      %c0_33 = arith.constant 0 : index
      %45 = vector.load %arg6[%c0_32, %c0_33] : memref<128x128xbf16, #tpu.memory_space<vmem>>, vector<128x128xbf16>
      %cst_34 = arith.constant dense<0.000000e+00> : vector<128x128xf32>
      %46 = tpu.matmul %44, %45, %cst_34 {dimension_numbers = #tpu.dot_dimension_numbers<[1], [0], [0], [1], [0, 0, 1, 1], [], []>} : vector<128x128xbf16>, vector<128x128xbf16>, vector<128x128xf32> -> vector<128x128xf32>
      %c0_35 = arith.constant 0 : index
      %c0_36 = arith.constant 0 : index
      %47 = vector.load %arg7[%c0_35, %c0_36] : memref<1x128xf32, #tpu.memory_space<vmem>>, vector<1x128xf32>
      %48 = vector.broadcast %47 : vector<1x128xf32> to vector<128x128xf32>
      %49 = arith.addf %46, %48 : vector<128x128xf32>
      %50 = math.tanh %49 : vector<128x128xf32>
      %51 = arith.truncf %50 : vector<128x128xf32> to vector<128x128xbf16>
      %c0_37 = arith.constant 0 : index
      %c0_38 = arith.constant 0 : index
      %52 = vector.load %arg8[%c0_37, %c0_38] : memref<128x128xbf16, #tpu.memory_space<vmem>>, vector<128x128xbf16>
      %cst_39 = arith.constant dense<0.000000e+00> : vector<128x128xf32>
      %53 = tpu.matmul %51, %52, %cst_39 {dimension_numbers = #tpu.dot_dimension_numbers<[1], [0], [0], [1], [0, 0, 1, 1], [], []>} : vector<128x128xbf16>, vector<128x128xbf16>, vector<128x128xf32> -> vector<128x128xf32>
      %54 = arith.addf %29, %53 : vector<128x128xf32>
      %c0_40 = arith.constant 0 : index
      %55 = arith.index_cast %35 : i32 to index
      %c0_41 = arith.constant 0 : index
      %c0_42 = arith.constant 0 : index
      %56 = vector.load %arg9[%c0_40, %55, %c0_41, %c0_42] : memref<1x8x128x128xf32, #tpu.memory_space<vmem>>, vector<1x1x128x128xf32>
      %57 = vector.shape_cast %56 : vector<1x1x128x128xf32> to vector<128x128xf32>
      %58 = vector.shape_cast %54 : vector<128x128xf32> to vector<1x1x128x128xf32>
      tpu.vector_store %arg9[%c0_40, %55, %c0_41, %c0_42], %58 {strides = array<i32>} : memref<1x8x128x128xf32, #tpu.memory_space<vmem>>, vector<1x1x128x128xf32>,
      %c4_i32_43 = arith.constant 4 : i32
      %59 = arith.muli %arg11, %c4_i32_43 : i32
      %c2_i32_44 = arith.constant 2 : i32
      %60 = arith.addi %59, %c2_i32_44 : i32
      %61 = arith.truncf %54 : vector<128x128xf32> to vector<128x128xbf16>
      %c0_45 = arith.constant 0 : index
      %c0_46 = arith.constant 0 : index
      %62 = vector.load %arg4[%c0_45, %c0_46] : memref<128x128xbf16, #tpu.memory_space<vmem>>, vector<128x128xbf16>
      %cst_47 = arith.constant dense<0.000000e+00> : vector<128x128xf32>
      %63 = tpu.matmul %61, %62, %cst_47 {dimension_numbers = #tpu.dot_dimension_numbers<[1], [0], [0], [1], [0, 0, 1, 1], [], []>} : vector<128x128xbf16>, vector<128x128xbf16>, vector<128x128xf32> -> vector<128x128xf32>
      %c0_48 = arith.constant 0 : index
      %c0_49 = arith.constant 0 : index
      %64 = vector.load %arg5[%c0_48, %c0_49] : memref<1x128xf32, #tpu.memory_space<vmem>>, vector<1x128xf32>
      %65 = vector.broadcast %64 : vector<1x128xf32> to vector<128x128xf32>
      %66 = arith.addf %63, %65 : vector<128x128xf32>
      %cst_50 = arith.constant 0.000000e+00 : f32
      %67 = vector.broadcast %cst_50 : f32 to vector<128x128xf32>
      %68 = arith.maximumf %66, %67 : vector<128x128xf32>
      %69 = arith.truncf %68 : vector<128x128xf32> to vector<128x128xbf16>
      %c0_51 = arith.constant 0 : index
      %c0_52 = arith.constant 0 : index
      %70 = vector.load %arg6[%c0_51, %c0_52] : memref<128x128xbf16, #tpu.memory_space<vmem>>, vector<128x128xbf16>
      %cst_53 = arith.constant dense<0.000000e+00> : vector<128x128xf32>
      %71 = tpu.matmul %69, %70, %cst_53 {dimension_numbers = #tpu.dot_dimension_numbers<[1], [0], [0], [1], [0, 0, 1, 1], [], []>} : vector<128x128xbf16>, vector<128x128xbf16>, vector<128x128xf32> -> vector<128x128xf32>
      %c0_54 = arith.constant 0 : index
      %c0_55 = arith.constant 0 : index
      %72 = vector.load %arg7[%c0_54, %c0_55] : memref<1x128xf32, #tpu.memory_space<vmem>>, vector<1x128xf32>
      %73 = vector.broadcast %72 : vector<1x128xf32> to vector<128x128xf32>
      %74 = arith.addf %71, %73 : vector<128x128xf32>
      %75 = math.tanh %74 : vector<128x128xf32>
      %76 = arith.truncf %75 : vector<128x128xf32> to vector<128x128xbf16>
      %c0_56 = arith.constant 0 : index
      %c0_57 = arith.constant 0 : index
      %77 = vector.load %arg8[%c0_56, %c0_57] : memref<128x128xbf16, #tpu.memory_space<vmem>>, vector<128x128xbf16>
      %cst_58 = arith.constant dense<0.000000e+00> : vector<128x128xf32>
      %78 = tpu.matmul %76, %77, %cst_58 {dimension_numbers = #tpu.dot_dimension_numbers<[1], [0], [0], [1], [0, 0, 1, 1], [], []>} : vector<128x128xbf16>, vector<128x128xbf16>, vector<128x128xf32> -> vector<128x128xf32>
      %79 = arith.addf %54, %78 : vector<128x128xf32>
      %c0_59 = arith.constant 0 : index
      %80 = arith.index_cast %60 : i32 to index
      %c0_60 = arith.constant 0 : index
      %c0_61 = arith.constant 0 : index
      %81 = vector.load %arg9[%c0_59, %80, %c0_60, %c0_61] : memref<1x8x128x128xf32, #tpu.memory_space<vmem>>, vector<1x1x128x128xf32>
      %82 = vector.shape_cast %81 : vector<1x1x128x128xf32> to vector<128x128xf32>
      %83 = vector.shape_cast %79 : vector<128x128xf32> to vector<1x1x128x128xf32>
      tpu.vector_store %arg9[%c0_59, %80, %c0_60, %c0_61], %83 {strides = array<i32>} : memref<1x8x128x128xf32, #tpu.memory_space<vmem>>, vector<1x1x128x128xf32>,
      %c4_i32_62 = arith.constant 4 : i32
      %84 = arith.muli %arg11, %c4_i32_62 : i32
      %c3_i32 = arith.constant 3 : i32
      %85 = arith.addi %84, %c3_i32 : i32
      %86 = arith.truncf %79 : vector<128x128xf32> to vector<128x128xbf16>
      %c0_63 = arith.constant 0 : index
      %c0_64 = arith.constant 0 : index
      %87 = vector.load %arg4[%c0_63, %c0_64] : memref<128x128xbf16, #tpu.memory_space<vmem>>, vector<128x128xbf16>
      %cst_65 = arith.constant dense<0.000000e+00> : vector<128x128xf32>
      %88 = tpu.matmul %86, %87, %cst_65 {dimension_numbers = #tpu.dot_dimension_numbers<[1], [0], [0], [1], [0, 0, 1, 1], [], []>} : vector<128x128xbf16>, vector<128x128xbf16>, vector<128x128xf32> -> vector<128x128xf32>
      %c0_66 = arith.constant 0 : index
      %c0_67 = arith.constant 0 : index
      %89 = vector.load %arg5[%c0_66, %c0_67] : memref<1x128xf32, #tpu.memory_space<vmem>>, vector<1x128xf32>
      %90 = vector.broadcast %89 : vector<1x128xf32> to vector<128x128xf32>
      %91 = arith.addf %88, %90 : vector<128x128xf32>
      %cst_68 = arith.constant 0.000000e+00 : f32
      %92 = vector.broadcast %cst_68 : f32 to vector<128x128xf32>
      %93 = arith.maximumf %91, %92 : vector<128x128xf32>
      %94 = arith.truncf %93 : vector<128x128xf32> to vector<128x128xbf16>
      %c0_69 = arith.constant 0 : index
      %c0_70 = arith.constant 0 : index
      %95 = vector.load %arg6[%c0_69, %c0_70] : memref<128x128xbf16, #tpu.memory_space<vmem>>, vector<128x128xbf16>
      %cst_71 = arith.constant dense<0.000000e+00> : vector<128x128xf32>
      %96 = tpu.matmul %94, %95, %cst_71 {dimension_numbers = #tpu.dot_dimension_numbers<[1], [0], [0], [1], [0, 0, 1, 1], [], []>} : vector<128x128xbf16>, vector<128x128xbf16>, vector<128x128xf32> -> vector<128x128xf32>
      %c0_72 = arith.constant 0 : index
      %c0_73 = arith.constant 0 : index
      %97 = vector.load %arg7[%c0_72, %c0_73] : memref<1x128xf32, #tpu.memory_space<vmem>>, vector<1x128xf32>
      %98 = vector.broadcast %97 : vector<1x128xf32> to vector<128x128xf32>
      %99 = arith.addf %96, %98 : vector<128x128xf32>
      %100 = math.tanh %99 : vector<128x128xf32>
      %101 = arith.truncf %100 : vector<128x128xf32> to vector<128x128xbf16>
      %c0_74 = arith.constant 0 : index
      %c0_75 = arith.constant 0 : index
      %102 = vector.load %arg8[%c0_74, %c0_75] : memref<128x128xbf16, #tpu.memory_space<vmem>>, vector<128x128xbf16>
      %cst_76 = arith.constant dense<0.000000e+00> : vector<128x128xf32>
      %103 = tpu.matmul %101, %102, %cst_76 {dimension_numbers = #tpu.dot_dimension_numbers<[1], [0], [0], [1], [0, 0, 1, 1], [], []>} : vector<128x128xbf16>, vector<128x128xbf16>, vector<128x128xf32> -> vector<128x128xf32>
      %104 = arith.addf %79, %103 : vector<128x128xf32>
      %c0_77 = arith.constant 0 : index
      %105 = arith.index_cast %85 : i32 to index
      %c0_78 = arith.constant 0 : index
      %c0_79 = arith.constant 0 : index
      %106 = vector.load %arg9[%c0_77, %105, %c0_78, %c0_79] : memref<1x8x128x128xf32, #tpu.memory_space<vmem>>, vector<1x1x128x128xf32>
      %107 = vector.shape_cast %106 : vector<1x1x128x128xf32> to vector<128x128xf32>
      %108 = vector.shape_cast %104 : vector<128x128xf32> to vector<1x1x128x128xf32>
      tpu.vector_store %arg9[%c0_77, %105, %c0_78, %c0_79], %108 {strides = array<i32>} : memref<1x8x128x128xf32, #tpu.memory_space<vmem>>, vector<1x1x128x128xf32>,
      scf.yield %104 : vector<128x128xf32>
    }
    %c2_i32_4 = arith.constant 2 : i32
    %c0_5 = arith.constant 0 : index
    %c0_6 = arith.constant 0 : index
    %8 = vector.load %arg10[%c0_5, %c0_6] : memref<128x128xf32, #tpu.memory_space<vmem>>, vector<128x128xf32>
    tpu.vector_store %arg10[%c0_5, %c0_6], %7 {strides = array<i32>} : memref<128x128xf32, #tpu.memory_space<vmem>>, vector<128x128xf32>,
    return
  }
  func.func @transform_0(%arg0: i32, %arg1: i32, %arg2: i32) -> (i32, i32) {
    %c0_i32 = arith.constant 0 : i32
    %c0_i32_0 = arith.constant 0 : i32
    return %arg0, %c0_i32 : i32, i32
  }
  func.func @transform_1(%arg0: i32, %arg1: i32, %arg2: i32) -> (i32, i32) {
    %c0_i32 = arith.constant 0 : i32
    %c0_i32_0 = arith.constant 0 : i32
    %c0_i32_1 = arith.constant 0 : i32
    return %c0_i32, %c0_i32_0 : i32, i32
  }
  func.func @transform_2(%arg0: i32, %arg1: i32, %arg2: i32) -> (i32, i32) {
    %c0_i32 = arith.constant 0 : i32
    %c0_i32_0 = arith.constant 0 : i32
    %c0_i32_1 = arith.constant 0 : i32
    return %c0_i32, %c0_i32_0 : i32, i32
  }
  func.func @transform_3(%arg0: i32, %arg1: i32, %arg2: i32) -> (i32, i32) {
    %c0_i32 = arith.constant 0 : i32
    %c0_i32_0 = arith.constant 0 : i32
    %c0_i32_1 = arith.constant 0 : i32
    return %c0_i32, %c0_i32_0 : i32, i32
  }
  func.func @transform_4(%arg0: i32, %arg1: i32, %arg2: i32) -> (i32, i32) {
    %c0_i32 = arith.constant 0 : i32
    %c0_i32_0 = arith.constant 0 : i32
    %c0_i32_1 = arith.constant 0 : i32
    return %c0_i32, %c0_i32_0 : i32, i32
  }
  func.func @transform_5(%arg0: i32, %arg1: i32, %arg2: i32) -> (i32, i32) {
    %c0_i32 = arith.constant 0 : i32
    %c0_i32_0 = arith.constant 0 : i32
    %c0_i32_1 = arith.constant 0 : i32
    return %c0_i32, %c0_i32_0 : i32, i32
  }
  func.func @transform_6(%arg0: i32, %arg1: i32, %arg2: i32) -> (i32, i32, i32, i32) {
    %c0_i32 = arith.constant 0 : i32
    %c0_i32_0 = arith.constant 0 : i32
    return %arg1, %arg2, %arg0, %c0_i32 : i32, i32, i32, i32
  }
  func.func @transform_7(%arg0: i32, %arg1: i32, %arg2: i32) -> (i32, i32) {
    %c0_i32 = arith.constant 0 : i32
    %c0_i32_0 = arith.constant 0 : i32
    return %arg0, %c0_i32 : i32, i32
  }
}

</mosaic_0001>

<bundles_post_ra>
// kernel: run_simulation.1
= control target key start
LH: loop header
LB: loop body
LE: loop exit
PB: predicated region body
PF: predicated region fallthrough
CT: control target
= control target key end

     0   :  { %s5112_s0 = inlined_call_operand.hbm [shape: f32[256,128], index: 0, kind: input, shape index: {}]   ;;  %s5113_s1 = inlined_call_operand.vmem [shape: bf16[128,128], index: 1, kind: input, shape index: {}]   ;;  %s5114_s2 = inlined_call_operand.hbm [shape: f32[1,128], index: 2, kind: input, shape index: {}]   ;;  %s5115_s3 = inlined_call_operand.vmem [shape: bf16[128,128], index: 3, kind: input, shape index: {}]   ;;  %s5116_s4 = inlined_call_operand.hbm [shape: f32[1,128], index: 4, kind: input, shape index: {}]   ;;  %s5117_s5 = inlined_call_operand.vmem [shape: bf16[128,128], index: 5, kind: input, shape index: {}]   ;;  %s5118_s6 = inlined_call_operand.hbm [shape: f32[2,8,256,128], index: 6, kind: output, shape index: {0}]   ;;  %s5119_s7 = inlined_call_operand.hbm [shape: f32[256,128], index: 7, kind: output, shape index: {1}]  }
   0x1   :  { %5135 = sst [smem:[#allocation27_spill]] %s5112_s0 }
   0x2   :  { %5136 = sst [smem:[#allocation28_spill]] %s5113_s1 }
   0x3   :  { %5137 = sst [smem:[#allocation29_spill]] %s5114_s2 }
   0x4   :  { %5138 = sst [smem:[#allocation30_spill]] %s5116_s4 }
   0x5   :  { %5139 = sst [smem:[#allocation31_spill]] %s5118_s6 }
   0x6   :  { %5140 = sst [smem:[#allocation32_spill]] %s5119_s7 }
   0x7   :  { %13 = vsyncpa [#allocation3], 0 }
   0x8   :  { %15 = vsyncpa [#allocation3 + $0x1], 0 }
   0x9   :  { %16 = vsyncpa [#allocation6], 0 }
   0xa   :  { %17 = vsyncpa [#allocation4], 0 }
   0xb   :  { %19 = vsyncpa [#allocation4 + $0x1], 0 }
   0xc   :  { %20 = vsyncpa [#allocation10], 0 }
   0xd   :  { %22 = vsyncpa [#allocation10 + $0x1], 0  ;;  %s3883_s24 = smov 0   ;;  %s3885_s25 = smov 0  }
   0xe   :  { %s3887_s26 = smov 0   ;;  %s3889_s27 = smov 0  }
   0xf   :  { %s3891_s28 = smov 0   ;;  %s3893_s29 = smov 0  }
  0x10   :  { %s3895_s30 = smov 0   ;;  %s3897_s8 = smov 0  }
  0x11   :  { %s3899_s9 = smov 0   ;;  %s3901_s10 = smov 0  }
  0x12   :  { %s3903_s11 = smov 0  }
  0x13 LB: > { %5141 = sst [smem:[#allocation17_spill]] %s3720_s24  ;;  %s2487_s12 = sadd.s32 4294967295, %s3760_s11   ;;  %s3760_s11 = sphi %s3903_s11, %s5209_s11   ;;  %s3756_s10 = sphi %s3901_s10, %s5208_s10   ;;  %s3752_s9 = sphi %s3899_s9, %s5207_s9   ;;  %s3748_s8 = sphi %s3897_s8, %s5206_s8   ;;  %s3744_s30 = sphi %s3895_s30, %s5198_s30   ;;  %s3740_s29 = sphi %s3893_s29, %s5205_s29   ;;  %s3736_s28 = sphi %s3891_s28, %s5204_s28   ;;  %s3732_s27 = sphi %s3889_s27, %s5203_s27   ;;  %s3728_s26 = sphi %s3887_s26, %s5202_s26   ;;  %s3724_s25 = sphi %s3885_s25, %s5201_s25   ;;  %s3720_s24 = sphi %s3883_s24, %s5200_s24  }
  0x14   : > { %5142 = sst [smem:[#allocation18_spill]] %s3732_s27  ;;  %s2488_s13 = sadd.s32 4294967294, %s3760_s11  }
  0x15   : > { %5143 = sst [smem:[#allocation19_spill]] %s3748_s8  ;;  %p61_p0 = scmp.ne.s32.totalorder %s3740_s29, %s3736_s28 }
  0x16   : > { %5144 = sst [smem:[#allocation20_spill]] %s3752_s9  ;;  %p62_p1 = scmp.eq.s32.totalorder %s3760_s11, 0 }
  0x17   : > { %5145 = sst [smem:[#allocation21_spill]] %s3760_s11  ;;  %p67_p2 = scmp.ne.s32.totalorder %s3736_s28, %s3732_s27 }
  0x18   : > { %p3946_p3 = scmp.eq.s32.totalorder %s2487_s12, 0  ;;  %p3951_p4 = por %p62_p1, %p61_p0 }
  0x19   : > { %p199_p5 = scmp.ne.s32.totalorder %s3728_s26, %s3724_s25  ;;  %p200_p7 = scmp.eq.s32.totalorder %s2487_s12, 3 }
  0x1a   : > { %p3959_p6 = por %p3946_p3, %p67_p2  ;;  %p205_p8 = scmp.ne.s32.totalorder %s3724_s25, %s3720_s24 }
  0x1b   : > { %p206_p9 = scmp.eq.s32.totalorder %s2488_s13, 3  ;;  %p3965_p10 = por %p200_p7, %p199_p5 }
  0x1c   : > { %s5148_s18 = scalar_select %p3959_p6, 1, 0 }
  0x1d   : > { %s5149_s19 = scalar_select %p3965_p10, 1, 0 }
  0x1e   : > { %p3969_p11 = por %p200_p7, %p61_p0  ;;  %p3973_p12 = por %p206_p9, %p205_p8 }
  0x1f   : > { %5150 = sst [smem:[#allocation22_spill]] %s5149_s19  ;;  %p3977_p13 = por %p206_p9, %p67_p2 }
  0x20   : > { %s5151_s20 = scalar_select %p3969_p11, 1, 0 }
  0x21   : > { %s5153_s21 = scalar_select %p3973_p12, 1, 0 }
  0x22   : > { %5152 = sst [smem:[#allocation23_spill]] %s5151_s20  ;;  %p2489_p1 = scmp.ge.s32.totalorder %s3760_s11, 1 }
  0x23   : > { %5154 = sst [smem:[#allocation24_spill]] %s5153_s21  ;;  %p239_p6 = scmp.lt.s32.totalorder %s3760_s11, 5 }
  0x24   : > { %s5155_s22 = scalar_select %p3977_p13, 1, 0 }
  0x25   : > { %s5157_s2 = sld [smem:[#allocation29_spill]]  ;;  %p3986_p5 = pnand %p2489_p1, %p239_p6 }
  0x26   : > { %5156 = sst [smem:[#allocation25_spill]] %s5155_s22  ;;  %s3830_s14 = smov [#allocation5]  }
  0x27   : > { %p3075_p0 = pneg %p3986_p5  ;;  %s256_s27 = sshll.u32 %s3830_s14, 4  ;;  %s257_s27 = int_to_ptr.vmem [resolvable:$true] %s256_s27 }
  0x28   : > { %p3095_p2 = scmp.lt.s32.totalorder %s3760_s11, 4  ;;  %s5159_s4 = sld [smem:[#allocation30_spill]] }
  0x29   : > { %p3076_p7 = pnand %p3075_p0, %p3946_p3  ;;  %s3831_s21 = smov [#allocation7]  }
  0x2a   : > { %p4000_p6 = pnand %p3095_p2, %p3951_p4  ;;  %s271_s14 = sshll.u32 %s3831_s21, 4  ;;  %s272_s14 = int_to_ptr.vmem [resolvable:$true] %s271_s14 }
  0x2b   : > { %s254_s13 = sshll.u32 %s5157_s2, 4  ;;  %s43_s24 = sadd.s32 1, %s3752_s9  ;;  %s255_s13 = int_to_ptr.hbm [resolvable:$true] %s254_s13 }
  0x2c   : > { %3078 = dma.hbm_to_vmem [thread:$0]  (!%p3076_p7), %s255_s13, 16, %s257_s27, [#allocation6]  }
  0x2d   : > { %p45_p8 = scmp.ge.s32.totalorder %s43_s24, 2  ;;  %s47_s11 = sadd.s32 1, %s3756_s10 }
  0x2e   : > { %s269_s2 = sshll.u32 %s5159_s4, 4  ;;  %s285_s7 = sand.u32 1, %s3740_s29   ;;  %s270_s2 = int_to_ptr.hbm [resolvable:$true] %s269_s2 }
  0x2f   : > { %3081 = dma.hbm_to_vmem [thread:$0]  (!%p3076_p7), %s270_s2, 16, %s272_s14, [#allocation6]  }
  0x30   : > { %s2952_s20 = sshll.u32 %s3756_s10, 7  ;;  %s5211_s24 = smov (%p45_p8, %s43_s24), 0 }
  0x31   : > { %5161 = sst [smem:[#allocation26_spill]] %s5211_s24  ;;  %s5213_s11 = smov (!%p45_p8, %s47_s11), %s3756_s10 }
  0x32   : > { %s182_s17 = ssub.s32 %s3752_s9, %s5211_s24  ;;  %p49_p4 = scmp.ge.s32.totalorder %s5213_s11, 2 }
  0x33   : > { %s2493_s27 = sshll.u32 %s285_s7, 7  ;;  %s5162_s0 = sld [smem:[#allocation27_spill]] }
  0x34   : > { %s5215_s11 = smov (%p49_p4, %s5213_s11), 0  ;;  %s289_s12 = scalar_lea.vmem [#allocation2], %s2493_s27 }
  0x35   : > { %s297_s14 = sshll.u32 %s289_s12, 4  ;;  %s51_s4 = ssub.s32 %s3756_s10, %s5215_s11  ;;  %s298_s14 = int_to_ptr.vmem [resolvable:$true] %s297_s14 }
  0x36   : > { %p52_p9 = scmp.eq.s32.totalorder %s51_s4, 0  ;;  %s186_s6 = sor.u32 %s182_s17, %s51_s4 }
  0x37   : > { %p187_p1 = scmp.eq.s32.totalorder %s186_s6, 0  ;;  %s5163_s24 = sadd.s32 1, %s3740_s29 }
  0x38   : > { %s4023_s9 = scalar_select %p52_p9, %s3740_s29, %s5163_s24  }
  0x39   : > { %s294_s2 = scalar_lea.hbm %s5162_s0, %s2952_s20  ;;  %s5164_s19 = sadd.s32 1, %s3728_s26 }
  0x3a   : > { %s295_s23 = sshll.u32 %s294_s2, 4  ;;  %s286_s20 = scalar_lea.sflag [#allocation3], %s285_s7  ;;  %s296_s23 = int_to_ptr.hbm [resolvable:$true] %s295_s23 }
  0x3b   : > { %s4028_s8 = scalar_select %p187_p1, %s3728_s26, %s5164_s19  }
  0x3c   : > { %s3832_s21 = smov 128   ;;  %s3833_s13 = smov 8  }
  0x3d   : > { %3085 = dma.hbm_to_vmem [thread:$0]  (!%p4000_p6), %s296_s23, 2048, %s298_s14, %s286_s20, %s3832_s21, %s3832_s21, %s3833_s13  }
  0x3e   : > { %309 = sbr.rel (%p3986_p5) target bundleno = 2009 (0x7d9), region = 44  ;;  %s4035_s27 = sand.u32 (!%p3986_p5), 1, %s3736_s28  }
  0x3f   : > { %s2497_s4 = sshll.u32 (!%p3986_p5), %s4035_s27, 7  ;;  %s312_s6 = scalar_lea.sflag (!%p3986_p5), [#allocation3], %s4035_s27 }
  0x40   : > { %s4039_s24 = scalar_lea.vmem (!%p3986_p5), [#allocation2], %s2497_s4  ;;  %p5165_p0 = scmp.ne.s32.totalorder (!%p3986_p5), %s5148_s18, 0 }
  0x43   : > { %3703 = dma.done.wait (%p5165_p0), %s312_s6, 2048  }
  0x44   : > { %3705 = vsyncadd (%p5165_p0), %s312_s6, 4294965248 }
  0x45   : > { %3707 = dma.done.wait (%p3946_p3), [#allocation6], 32  }
  0x46   : > { %3709 = vsyncadd (%p3946_p3), [#allocation6], 4294967264  ;;  %s352_s7 = sand.u32 1, %s3724_s25   ;;  %p366_p5 = scmp.eq.s32.totalorder %s3744_s30, 0 }
  0x47   : > { %s4052_s16 = sshll.u32 %s352_s7, 10  ;;  %s4056_s22 = scalar_lea.vmem [#allocation9], %s2497_s4  ;;  %v372_v0 = vld [vmem:[%s4039_s24] sm:$0xff] (%p366_p5)  ;;  %v373_v1 = vld [vmem:[%s4039_s24 + $0x8] sm:$0xff] (%p366_p5)  ;;  %v374_v2 = vld [vmem:[%s4039_s24 + $0x10] sm:$0xff] (%p366_p5) }
  0x48   : > { %s354_s19 = scalar_lea.vmem [#allocation8], %s4052_s16  ;;  %371 = sbr.rel (!%p366_p5) target bundleno = 88 (0x58), region = 60  ;;  %388 = vst [vmem:[%s4056_s22] sm:$0xff] (%p366_p5), %v372_v0  ;;  %v375_v3 = vld [vmem:[%s4039_s24 + $0x18] sm:$0xff] (%p366_p5)  ;;  %v376_v4 = vld [vmem:[%s4039_s24 + $0x20] sm:$0xff] (%p366_p5)  ;;  %v377_v5 = vld [vmem:[%s4039_s24 + $0x28] sm:$0xff] (%p366_p5) }
  0x49   : > { %389 = vst [vmem:[%s4056_s22 + $0x8] sm:$0xff] (%p366_p5), %v373_v1  ;;  %v378_v6 = vld [vmem:[%s4039_s24 + $0x30] sm:$0xff] (%p366_p5)  ;;  %v379_v7 = vld [vmem:[%s4039_s24 + $0x38] sm:$0xff] (%p366_p5)  ;;  %v380_v8 = vld [vmem:[%s4039_s24 + $0x40] sm:$0xff] (%p366_p5) }
  0x4a   : > { %390 = vst [vmem:[%s4056_s22 + $0x10] sm:$0xff] (%p366_p5), %v374_v2  ;;  %v381_v9 = vld [vmem:[%s4039_s24 + $0x48] sm:$0xff] (%p366_p5)  ;;  %v382_v10 = vld [vmem:[%s4039_s24 + $0x50] sm:$0xff] (%p366_p5)  ;;  %v383_v11 = vld [vmem:[%s4039_s24 + $0x58] sm:$0xff] (%p366_p5) }
  0x4b   : > { %391 = vst [vmem:[%s4056_s22 + $0x18] sm:$0xff] (%p366_p5), %v375_v3  ;;  %v384_v12 = vld [vmem:[%s4039_s24 + $0x60] sm:$0xff] (%p366_p5)  ;;  %v385_v13 = vld [vmem:[%s4039_s24 + $0x68] sm:$0xff] (%p366_p5)  ;;  %v386_v14 = vld [vmem:[%s4039_s24 + $0x70] sm:$0xff] (%p366_p5) }
  0x4c   : > { %392 = vst [vmem:[%s4056_s22 + $0x20] sm:$0xff] (%p366_p5), %v376_v4  ;;  %v387_v15 = vld [vmem:[%s4039_s24 + $0x78] sm:$0xff] (%p366_p5) }
  0x4d   : > { %393 = vst [vmem:[%s4056_s22 + $0x28] sm:$0xff] %v377_v5 }
  0x4e   : > { %394 = vst [vmem:[%s4056_s22 + $0x30] sm:$0xff] %v378_v6 }
  0x4f   : > { %395 = vst [vmem:[%s4056_s22 + $0x38] sm:$0xff] %v379_v7 }
  0x50   : > { %396 = vst [vmem:[%s4056_s22 + $0x40] sm:$0xff] %v380_v8 }
  0x51   : > { %397 = vst [vmem:[%s4056_s22 + $0x48] sm:$0xff] %v381_v9 }
  0x52   : > { %398 = vst [vmem:[%s4056_s22 + $0x50] sm:$0xff] %v382_v10 }
  0x53   : > { %399 = vst [vmem:[%s4056_s22 + $0x58] sm:$0xff] %v383_v11 }
  0x54   : > { %400 = vst [vmem:[%s4056_s22 + $0x60] sm:$0xff] %v384_v12 }
  0x55   : > { %401 = vst [vmem:[%s4056_s22 + $0x68] sm:$0xff] %v385_v13 }
  0x56   : > { %402 = vst [vmem:[%s4056_s22 + $0x70] sm:$0xff] %v386_v14 }
  0x57   : > { %403 = vst [vmem:[%s4056_s22 + $0x78] sm:$0xff] %v387_v15 }
  0x58 PF: > { %v410_v22 = vld [vmem:[%s4056_s22 + $0x30] sm:$0xff]   ;;  %v411_v23 = vld [vmem:[%s4056_s22 + $0x38] sm:$0xff]   ;;  %v412_v24 = vld [vmem:[%s4056_s22 + $0x40] sm:$0xff]   ;;  %s4138_s15 = smov 0  }
  0x59   : > { %v413_v25 = vld [vmem:[%s4056_s22 + $0x48] sm:$0xff]   ;;  %v414_v26 = vld [vmem:[%s4056_s22 + $0x50] sm:$0xff]  }
  0x5a   : > { %v404_v16 = vld [vmem:[%s4056_s22] sm:$0xff]   ;;  %v415_v27 = vld [vmem:[%s4056_s22 + $0x58] sm:$0xff]  }
  0x5b   : > { %v405_v17 = vld [vmem:[%s4056_s22 + $0x8] sm:$0xff]   ;;  %v416_v28 = vld [vmem:[%s4056_s22 + $0x60] sm:$0xff]  }
  0x5c   : > { %v406_v18 = vld [vmem:[%s4056_s22 + $0x10] sm:$0xff]   ;;  %v417_v29 = vld [vmem:[%s4056_s22 + $0x68] sm:$0xff]  }
  0x5d   : > { %v407_v19 = vld [vmem:[%s4056_s22 + $0x18] sm:$0xff]   ;;  %v418_v30 = vld [vmem:[%s4056_s22 + $0x70] sm:$0xff]  }
  0x5e   : > { %v408_v20 = vld [vmem:[%s4056_s22 + $0x20] sm:$0xff]   ;;  %v419_v31 = vld [vmem:[%s4056_s22 + $0x78] sm:$0xff]  }
  0x5f   : > { %v409_v21 = vld [vmem:[%s4056_s22 + $0x28] sm:$0xff]  }
  0x60 LB: >> { %s5166_s1 = sld [smem:[#allocation28_spill]]  ;;  %v443_v40 = vpack.c.bf16 %v3820_v17, %v3824_v16  ;;  %v444_v41 = vpack.c.bf16 %v3812_v19, %v3816_v18  ;;  %v445_v42 = vpack.c.bf16 %v3804_v21, %v3808_v20  ;;  %v446_v43 = vpack.c.bf16 %v3796_v23, %v3800_v22  ;;  %v2969_v45 = vld [vmem:[%s5115_s3 + $0x38] sm:$0xff]  ;;  %v2968_v47 = vld [vmem:[%s5115_s3 + $0x30] sm:$0xff]  ;;  %v2967_v48 = vld [vmem:[%s5115_s3 + $0x28] sm:$0xff]  ;;  %s2978_s12 = sshll.u32 %s3828_s15, 9  ;;  %s3828_s15 = sphi %s4138_s15, %s425_s15   ;;  %v3824_v16 = vphi %v404_v16, %v5185_v16   ;;  %v3820_v17 = vphi %v405_v17, %v5184_v17   ;;  %v3816_v18 = vphi %v406_v18, %v5183_v18   ;;  %v3812_v19 = vphi %v407_v19, %v5182_v19   ;;  %v3808_v20 = vphi %v408_v20, %v5181_v20   ;;  %v3804_v21 = vphi %v409_v21, %v5180_v21   ;;  %v3800_v22 = vphi %v410_v22, %v5179_v22   ;;  %v3796_v23 = vphi %v411_v23, %v5178_v23   ;;  %v3792_v24 = vphi %v412_v24, %v5177_v24   ;;  %v3788_v25 = vphi %v413_v25, %v5176_v25   ;;  %v3784_v26 = vphi %v414_v26, %v5175_v26   ;;  %v3780_v27 = vphi %v415_v27, %v5174_v27   ;;  %v3776_v28 = vphi %v416_v28, %v5173_v28   ;;  %v3772_v29 = vphi %v417_v29, %v5172_v29   ;;  %v3768_v30 = vphi %v418_v30, %v5171_v30   ;;  %v3764_v31 = vphi %v419_v31, %v5170_v31  }
  0x61   : >> { %v447_v44 = vpack.c.bf16 %v3788_v25, %v3792_v24  ;;  %660 = vmatpush.bf16.msra.mxu1 %v2969_v45  ;;  %v448_v46 = vpack.c.bf16 %v3780_v27, %v3784_v26  ;;  %v2966_v49 = vld [vmem:[%s5115_s3 + $0x20] sm:$0xff]  ;;  %v2965_v50 = vld [vmem:[%s5115_s3 + $0x18] sm:$0xff]  ;;  %v449_v51 = vpack.c.bf16 %v3772_v29, %v3776_v28  ;;  %v2964_v52 = vld [vmem:[%s5115_s3 + $0x10] sm:$0xff]  ;;  %v450_v55 = vpack.c.bf16 %v3764_v31, %v3768_v30  ;;  %s4345_s21 = scalar_lea.vmem %s354_s19, %s2978_s12 [#allocation8]  ;;  %s425_s15 = sadd.s32 1, %s3828_s15  }
  0x62   : >> { %v2963_v53 = vld [vmem:[%s5115_s3 + $0x8] sm:$0xff]  ;;  %v2962_v54 = vld [vmem:[%s5115_s3] sm:$0xff]  ;;  %p4971_p3 = scmp.ge.s32.totalorder %s425_s15, 2  }
  0x63   : >> { %v4255_v57 = vld [vmem:[#allocation5] ss:$0 sm:$0xff]  ;;  %s2211_s15 = scalar_lea.sflag (%p4971_p3), [#allocation4], %s352_s7 }
  0x65   : >> { %661 = vmatpush.bf16.msra.mxu1 %v2968_v47 }
  0x66   : >> { %v2961_v32 = vld [vmem:[%s5166_s1 + $0x38] sm:$0xff]  ;;  %v2960_v33 = vld [vmem:[%s5166_s1 + $0x30] sm:$0xff]  ;;  %v2959_v34 = vld [vmem:[%s5166_s1 + $0x28] sm:$0xff] }
  0x67   : >> { %519 = vmatpush.bf16.msra.mxu0 %v2961_v32  ;;  %v2958_v35 = vld [vmem:[%s5166_s1 + $0x20] sm:$0xff]  ;;  %v2957_v36 = vld [vmem:[%s5166_s1 + $0x18] sm:$0xff]  ;;  %v2956_v37 = vld [vmem:[%s5166_s1 + $0x10] sm:$0xff] }
  0x68   : >> { %v2955_v38 = vld [vmem:[%s5166_s1 + $0x8] sm:$0xff]  ;;  %v2954_v39 = vld [vmem:[%s5166_s1] sm:$0xff] }
  0x69   : >> { %662 = vmatpush.bf16.msra.mxu1 %v2967_v48 }
  0x6b   : >> { %520 = vmatpush.bf16.msra.mxu0 %v2960_v33 }
  0x6d   : >> { %663 = vmatpush.bf16.msra.mxu1 %v2966_v49 }
  0x6f   : >> { %521 = vmatpush.bf16.msra.mxu0 %v2959_v34 }
  0x71   : >> { %664 = vmatpush.bf16.msra.mxu1 %v2965_v50 }
  0x73   : >> { %522 = vmatpush.bf16.msra.mxu0 %v2958_v35 }
  0x75   : >> { %665 = vmatpush.bf16.msra.mxu1 %v2964_v52 }
  0x77   : >> { %523 = vmatpush.bf16.msra.mxu0 %v2957_v36 }
  0x79   : >> { %666 = vmatpush.bf16.msra.mxu1 %v2963_v53  ;;  %v2976_v53 = vld [vmem:[%s5117_s5 + $0x30] sm:$0xff] }
  0x7b   : >> { %524 = vmatpush.bf16.msra.mxu0 %v2956_v37 }
  0x7d   : >> { %667 = vmatpush.bf16.msra.mxu1 %v2962_v54  ;;  %v2975_v54 = vld [vmem:[%s5117_s5 + $0x28] sm:$0xff] }
  0x7f   : >> { %525 = vmatpush.bf16.msra.mxu0 %v2955_v38 }
  0x83   : >> { %526 = vmatpush.bf16.msra.mxu0 %v2954_v39 }
  0x86   : >> { %527 = vmatmul.bf16.vlgmr.msra.gmra.mxu0 %v443_v40 }
  0x96   : >> { %532 = vmatmul.bf16.gmra.mxu0 %v444_v41 }
  0xa6   : >> { %537 = vmatmul.bf16.gmra.mxu0 %v445_v42 }
  0xb6   : >> { %542 = vmatmul.bf16.gmra.mxu0 %v446_v43 }
  0xc6   : >> { %547 = vmatmul.bf16.gmra.mxu0 %v447_v44 }
  0xd6   : >> { %552 = vmatmul.bf16.gmra.mxu0 %v448_v46 }
  0xe6   : >> { %557 = vmatmul.bf16.gmra.mxu0 %v449_v51  ;;  %v2977_v51 = vld [vmem:[%s5117_s5 + $0x38] sm:$0xff] }
  0xe7   : >> { %797 = vmatpush.bf16.msra.mxu2 %v2977_v51 }
  0xeb   : >> { %798 = vmatpush.bf16.msra.mxu2 %v2976_v53 }
  0xef   : >> { %799 = vmatpush.bf16.msra.mxu2 %v2975_v54 }
  0xf6   : >> { %562 = vmatmul.bf16.gmra.mxu0 %v450_v55 }
 0x103   : >> { %v528_v56 = vpop.f32.mrf.mxu0 }
 0x104   : >> { %v529_v58 = vadd.f32 %v4255_v57, %v528_v56 }
 0x106   : >> { %v568_v61 = vmax.f32 %v529_v58, 0.0 }
 0x10b   : >> { %v530_v59 = vpop.f32.mrf.mxu0 }
 0x10c   : >> { %v531_v60 = vadd.f32 %v4255_v57, %v530_v59 }
 0x10e   : >> { %v569_v62 = vmax.f32 %v531_v60, 0.0 }
 0x110   : >> { %v584_v63 = vpack.c.bf16 %v569_v62, %v568_v61  ;;  %v2974_v61 = vld [vmem:[%s5117_s5 + $0x20] sm:$0xff] }
 0x111   : >> { %800 = vmatpush.bf16.msra.mxu2 %v2974_v61 }
 0x112   : >> { %668 = vmatmul.bf16.vlgmr.msra.gmra.mxu1 %v584_v63  ;;  %v2973_v63 = vld [vmem:[%s5117_s5 + $0x18] sm:$0xff] }
 0x113   : >> { %v533_v0 = vpop.f32.mrf.mxu0 }
 0x114   : >> { %v534_v1 = vadd.f32 %v4255_v57, %v533_v0 }
 0x115   : >> { %801 = vmatpush.bf16.msra.mxu2 %v2973_v63 }
 0x116   : >> { %v570_v4 = vmax.f32 %v534_v1, 0.0  ;;  %v2972_v1 = vld [vmem:[%s5117_s5 + $0x10] sm:$0xff] }
 0x119   : >> { %802 = vmatpush.bf16.msra.mxu2 %v2972_v1 }
 0x11b   : >> { %v535_v2 = vpop.f32.mrf.mxu0 }
 0x11c   : >> { %v536_v3 = vadd.f32 %v4255_v57, %v535_v2 }
 0x11e   : >> { %v571_v5 = vmax.f32 %v536_v3, 0.0  ;;  %v2971_v3 = vld [vmem:[%s5117_s5 + $0x8] sm:$0xff] }
 0x11f   : >> { %803 = vmatpush.bf16.msra.mxu2 %v2971_v3 }
 0x120   : >> { %v585_v6 = vpack.c.bf16 %v571_v5, %v570_v4 }
 0x122   : >> { %673 = vmatmul.bf16.gmra.mxu1 %v585_v6 }
 0x123   : >> { %v538_v7 = vpop.f32.mrf.mxu0 }
 0x124   : >> { %v539_v8 = vadd.f32 %v4255_v57, %v538_v7 }
 0x126   : >> { %v572_v11 = vmax.f32 %v539_v8, 0.0  ;;  %v2970_v8 = vld [vmem:[%s5117_s5] sm:$0xff] }
 0x127   : >> { %804 = vmatpush.bf16.msra.mxu2 %v2970_v8 }
 0x12b   : >> { %v540_v9 = vpop.f32.mrf.mxu0 }
 0x12c   : >> { %v541_v10 = vadd.f32 %v4255_v57, %v540_v9 }
 0x12e   : >> { %v573_v12 = vmax.f32 %v541_v10, 0.0 }
 0x130   : >> { %v586_v13 = vpack.c.bf16 %v573_v12, %v572_v11  ;;  %v4297_v11 = vld [vmem:[#allocation7] ss:$0 sm:$0xff] }
 0x132   : >> { %678 = vmatmul.bf16.gmra.mxu1 %v586_v13 }
 0x133   : >> { %v543_v14 = vpop.f32.mrf.mxu0 }
 0x134   : >> { %v544_v15 = vadd.f32 %v4255_v57, %v543_v14 }
 0x136   : >> { %v574_v34 = vmax.f32 %v544_v15, 0.0 }
 0x13b   : >> { %v545_v32 = vpop.f32.mrf.mxu0 }
 0x13c   : >> { %v546_v33 = vadd.f32 %v4255_v57, %v545_v32 }
 0x13e   : >> { %v575_v35 = vmax.f32 %v546_v33, 0.0 }
 0x140   : >> { %v587_v36 = vpack.c.bf16 %v575_v35, %v574_v34 }
 0x142   : >> { %683 = vmatmul.bf16.gmra.mxu1 %v587_v36 }
 0x143   : >> { %v548_v37 = vpop.f32.mrf.mxu0 }
 0x144   : >> { %v549_v38 = vadd.f32 %v4255_v57, %v548_v37 }
 0x146   : >> { %v576_v41 = vmax.f32 %v549_v38, 0.0 }
 0x14b   : >> { %v550_v39 = vpop.f32.mrf.mxu0 }
 0x14c   : >> { %v551_v40 = vadd.f32 %v4255_v57, %v550_v39 }
 0x14e   : >> { %v577_v42 = vmax.f32 %v551_v40, 0.0 }
 0x150   : >> { %v588_v43 = vpack.c.bf16 %v577_v42, %v576_v41 }
 0x152   : >> { %688 = vmatmul.bf16.gmra.mxu1 %v588_v43 }
 0x153   : >> { %v553_v44 = vpop.f32.mrf.mxu0 }
 0x154   : >> { %v554_v45 = vadd.f32 %v4255_v57, %v553_v44 }
 0x156   : >> { %v578_v48 = vmax.f32 %v554_v45, 0.0 }
 0x15b   : >> { %v555_v46 = vpop.f32.mrf.mxu0 }
 0x15c   : >> { %v556_v47 = vadd.f32 %v4255_v57, %v555_v46 }
 0x15e   : >> { %v579_v49 = vmax.f32 %v556_v47, 0.0 }
 0x160   : >> { %v589_v50 = vpack.c.bf16 %v579_v49, %v578_v48 }
 0x162   : >> { %693 = vmatmul.bf16.gmra.mxu1 %v589_v50 }
 0x163   : >> { %v558_v52 = vpop.f32.mrf.mxu0 }
 0x164   : >> { %v559_v55 = vadd.f32 %v4255_v57, %v558_v52 }
 0x166   : >> { %v580_v59 = vmax.f32 %v559_v55, 0.0 }
 0x16b   : >> { %v560_v56 = vpop.f32.mrf.mxu0 }
 0x16c   : >> { %v561_v58 = vadd.f32 %v4255_v57, %v560_v56 }
 0x16e   : >> { %v581_v60 = vmax.f32 %v561_v58, 0.0 }
 0x170   : >> { %v590_v62 = vpack.c.bf16 %v581_v60, %v580_v59 }
 0x172   : >> { %698 = vmatmul.bf16.gmra.mxu1 %v590_v62 }
 0x173   : >> { %v563_v0 = vpop.f32.mrf.mxu0 }
 0x174   : >> { %v564_v2 = vadd.f32 %v4255_v57, %v563_v0 }
 0x176   : >> { %v582_v6 = vmax.f32 %v564_v2, 0.0 }
 0x17b   : >> { %v565_v4 = vpop.f32.mrf.mxu0 }
 0x17c   : >> { %v566_v5 = vadd.f32 %v4255_v57, %v565_v4 }
 0x17e   : >> { %v583_v7 = vmax.f32 %v566_v5, 0.0 }
 0x180   : >> { %v591_v9 = vpack.c.bf16 %v583_v7, %v582_v6  ;;  %v2986_v6 = vld [vmem:[%s5166_s1 + $0x38] sm:$0xff]  ;;  %v2985_v7 = vld [vmem:[%s5166_s1 + $0x30] sm:$0xff] }
 0x181   : >> { %957 = vmatpush.bf16.msra.mxu3 %v2986_v6 }
 0x182   : >> { %703 = vmatmul.bf16.gmra.mxu1 %v591_v9 }
 0x185   : >> { %958 = vmatpush.bf16.msra.mxu3 %v2985_v7 }
 0x18f   : >> { %v669_v10 = vpop.f32.mrf.mxu1 }
 0x190   : >> { %v670_v12 = vadd.f32 %v4297_v11, %v669_v10 }
 0x192   : >> { %3344 = vtanh.f32 %v670_v12  ;;  %v2984_v12 = vld [vmem:[%s5166_s1 + $0x28] sm:$0xff] }
 0x193   : >> { %959 = vmatpush.bf16.msra.mxu3 %v2984_v12 }
 0x197   : >> { %v671_v13 = vpop.f32.mrf.mxu1 }
 0x198   : >> { %v672_v14 = vadd.f32 %v4297_v11, %v671_v13  ;;  %v3345_v57 = vpop.eup %3344  ;;  %v2983_v13 = vld [vmem:[%s5166_s1 + $0x20] sm:$0xff] }
 0x199   : >> { %960 = vmatpush.bf16.msra.mxu3 %v2983_v13 }
 0x19a   : >> { %3346 = vtanh.f32 %v672_v14 }
 0x19f   : >> { %v674_v15 = vpop.f32.mrf.mxu1 }
 0x1a0   : >> { %v3347_v32 = vpop.eup %3346  ;;  %v675_v34 = vadd.f32 %v4297_v11, %v674_v15 }
 0x1a1   : >> { %v725_v33 = vpack.c.bf16 %v3347_v32, %v3345_v57  ;;  %v2982_v32 = vld [vmem:[%s5166_s1 + $0x18] sm:$0xff] }
 0x1a2   : >> { %3348 = vtanh.f32 %v675_v34  ;;  %961 = vmatpush.bf16.msra.mxu3 %v2982_v32 }
 0x1a3   : >> { %805 = vmatmul.bf16.vlgmr.msra.gmra.mxu2 %v725_v33 }
 0x1a7   : >> { %v676_v35 = vpop.f32.mrf.mxu1 }
 0x1a8   : >> { %v677_v36 = vadd.f32 %v4297_v11, %v676_v35  ;;  %v3349_v37 = vpop.eup %3348  ;;  %v2981_v35 = vld [vmem:[%s5166_s1 + $0x10] sm:$0xff] }
 0x1a9   : >> { %962 = vmatpush.bf16.msra.mxu3 %v2981_v35 }
 0x1aa   : >> { %3350 = vtanh.f32 %v677_v36 }
 0x1af   : >> { %v679_v38 = vpop.f32.mrf.mxu1 }
 0x1b0   : >> { %v3351_v39 = vpop.eup %3350  ;;  %v680_v41 = vadd.f32 %v4297_v11, %v679_v38  ;;  %v2980_v38 = vld [vmem:[%s5166_s1 + $0x8] sm:$0xff] }
 0x1b1   : >> { %v726_v40 = vpack.c.bf16 %v3351_v39, %v3349_v37  ;;  %963 = vmatpush.bf16.msra.mxu3 %v2980_v38  ;;  %v2979_v39 = vld [vmem:[%s5166_s1] sm:$0xff] }
 0x1b2   : >> { %3352 = vtanh.f32 %v680_v41 }
 0x1b3   : >> { %810 = vmatmul.bf16.gmra.mxu2 %v726_v40 }
 0x1b5   : >> { %964 = vmatpush.bf16.msra.mxu3 %v2979_v39 }
 0x1b7   : >> { %v681_v42 = vpop.f32.mrf.mxu1 }
 0x1b8   : >> { %v682_v43 = vadd.f32 %v4297_v11, %v681_v42  ;;  %v3353_v44 = vpop.eup %3352 }
 0x1ba   : >> { %3354 = vtanh.f32 %v682_v43 }
 0x1bf   : >> { %v684_v45 = vpop.f32.mrf.mxu1 }
 0x1c0   : >> { %v3355_v46 = vpop.eup %3354  ;;  %v685_v48 = vadd.f32 %v4297_v11, %v684_v45 }
 0x1c1   : >> { %v727_v47 = vpack.c.bf16 %v3355_v46, %v3353_v44 }
 0x1c2   : >> { %3356 = vtanh.f32 %v685_v48  ;;  %v2993_v48 = vld [vmem:[%s5115_s3 + $0x30] sm:$0xff] }
 0x1c3   : >> { %815 = vmatmul.bf16.gmra.mxu2 %v727_v47 }
 0x1c7   : >> { %v686_v49 = vpop.f32.mrf.mxu1 }
 0x1c8   : >> { %v687_v50 = vadd.f32 %v4297_v11, %v686_v49  ;;  %v3357_v51 = vpop.eup %3356 }
 0x1ca   : >> { %3358 = vtanh.f32 %v687_v50 }
 0x1cf   : >> { %v689_v52 = vpop.f32.mrf.mxu1 }
 0x1d0   : >> { %v3359_v53 = vpop.eup %3358  ;;  %v690_v55 = vadd.f32 %v4297_v11, %v689_v52  ;;  %v2992_v52 = vld [vmem:[%s5115_s3 + $0x28] sm:$0xff] }
 0x1d1   : >> { %v728_v54 = vpack.c.bf16 %v3359_v53, %v3357_v51 }
 0x1d2   : >> { %3360 = vtanh.f32 %v690_v55 }
 0x1d3   : >> { %820 = vmatmul.bf16.gmra.mxu2 %v728_v54 }
 0x1d7   : >> { %v691_v56 = vpop.f32.mrf.mxu1 }
 0x1d8   : >> { %v692_v58 = vadd.f32 %v4297_v11, %v691_v56  ;;  %v3361_v59 = vpop.eup %3360  ;;  %v2991_v56 = vld [vmem:[%s5115_s3 + $0x20] sm:$0xff] }
 0x1da   : >> { %3362 = vtanh.f32 %v692_v58 }
 0x1df   : >> { %v694_v60 = vpop.f32.mrf.mxu1 }
 0x1e0   : >> { %v3363_v61 = vpop.eup %3362  ;;  %v695_v63 = vadd.f32 %v4297_v11, %v694_v60 }
 0x1e1   : >> { %v729_v62 = vpack.c.bf16 %v3363_v61, %v3361_v59  ;;  %v2990_v61 = vld [vmem:[%s5115_s3 + $0x18] sm:$0xff] }
 0x1e2   : >> { %3364 = vtanh.f32 %v695_v63 }
 0x1e3   : >> { %825 = vmatmul.bf16.gmra.mxu2 %v729_v62 }
 0x1e7   : >> { %v696_v0 = vpop.f32.mrf.mxu1 }
 0x1e8   : >> { %v697_v1 = vadd.f32 %v4297_v11, %v696_v0  ;;  %v3365_v2 = vpop.eup %3364 }
 0x1ea   : >> { %3366 = vtanh.f32 %v697_v1  ;;  %v2989_v1 = vld [vmem:[%s5115_s3 + $0x10] sm:$0xff] }
 0x1ef   : >> { %v699_v3 = vpop.f32.mrf.mxu1 }
 0x1f0   : >> { %v3367_v4 = vpop.eup %3366  ;;  %v700_v8 = vadd.f32 %v4297_v11, %v699_v3 }
 0x1f1   : >> { %v730_v5 = vpack.c.bf16 %v3367_v4, %v3365_v2 }
 0x1f2   : >> { %3368 = vtanh.f32 %v700_v8 }
 0x1f3   : >> { %830 = vmatmul.bf16.gmra.mxu2 %v730_v5  ;;  %v2988_v5 = vld [vmem:[%s5115_s3 + $0x8] sm:$0xff] }
 0x1f7   : >> { %v701_v9 = vpop.f32.mrf.mxu1 }
 0x1f8   : >> { %v702_v10 = vadd.f32 %v4297_v11, %v701_v9  ;;  %v3369_v14 = vpop.eup %3368 }
 0x1fa   : >> { %3370 = vtanh.f32 %v702_v10 }
 0x1ff   : >> { %v704_v57 = vpop.f32.mrf.mxu1 }
 0x200   : >> { %v3371_v15 = vpop.eup %3370  ;;  %v705_v34 = vadd.f32 %v4297_v11, %v704_v57  ;;  %v4464_v57 = vld [vmem:[#allocation5] ss:$0 sm:$0xff] }
 0x201   : >> { %v731_v33 = vpack.c.bf16 %v3371_v15, %v3369_v14 }
 0x202   : >> { %3372 = vtanh.f32 %v705_v34 }
 0x203   : >> { %835 = vmatmul.bf16.gmra.mxu2 %v731_v33 }
 0x207   : >> { %v706_v36 = vpop.f32.mrf.mxu1 }
 0x208   : >> { %v707_v37 = vadd.f32 %v4297_v11, %v706_v36  ;;  %v3373_v40 = vpop.eup %3372  ;;  %v2994_v11 = vld [vmem:[%s5115_s3 + $0x38] sm:$0xff] }
 0x209   : >> { %1098 = vmatpush.bf16.msrb.mxu0 %v2994_v11 }
 0x20a   : >> { %3374 = vtanh.f32 %v707_v37  ;;  %v3001_v37 = vld [vmem:[%s5117_s5 + $0x30] sm:$0xff] }
 0x20d   : >> { %1099 = vmatpush.bf16.msrb.mxu0 %v2993_v48 }
 0x210   : >> { %v3375_v41 = vpop.eup %3374 }
 0x211   : >> { %v732_v42 = vpack.c.bf16 %v3375_v41, %v3373_v40  ;;  %1100 = vmatpush.bf16.msrb.mxu0 %v2992_v52 }
 0x213   : >> { %840 = vmatmul.bf16.gmra.mxu2 %v732_v42 }
 0x215   : >> { %1101 = vmatpush.bf16.msrb.mxu0 %v2991_v56 }
 0x219   : >> { %1102 = vmatpush.bf16.msrb.mxu0 %v2990_v61 }
 0x21d   : >> { %1103 = vmatpush.bf16.msrb.mxu0 %v2989_v1 }
 0x221   : >> { %1104 = vmatpush.bf16.msrb.mxu0 %v2988_v5 }
 0x226   : >> { %v806_v43 = vpop.f32.mrf.mxu2 }
 0x227   : >> { %v4348_v44 = vadd.f32 %v3824_v16, %v806_v43 }
 0x229   : >> { %864 = vst [vmem:[%s4345_s21] sm:$0xff] %v4348_v44 }
 0x22e   : >> { %v808_v45 = vpop.f32.mrf.mxu2 }
 0x22f   : >> { %v4353_v46 = vadd.f32 %v3820_v17, %v808_v45  ;;  %v3000_v45 = vld [vmem:[%s5117_s5 + $0x28] sm:$0xff] }
 0x231   : >> { %865 = vst [vmem:[%s4345_s21 + $0x8] sm:$0xff] %v4353_v46  ;;  %v881_v47 = vpack.c.bf16 %v4353_v46, %v4348_v44 }
 0x233   : >> { %965 = vmatmul.bf16.vlgmr.msra.gmra.mxu3 %v881_v47 }
 0x236   : >> { %v811_v16 = vpop.f32.mrf.mxu2 }
 0x237   : >> { %v4363_v49 = vadd.f32 %v3816_v18, %v811_v16 }
 0x239   : >> { %866 = vst [vmem:[%s4345_s21 + $0x10] sm:$0xff] %v4363_v49 }
 0x23e   : >> { %v813_v17 = vpop.f32.mrf.mxu2 }
 0x23f   : >> { %v4368_v50 = vadd.f32 %v3812_v19, %v813_v17 }
 0x241   : >> { %867 = vst [vmem:[%s4345_s21 + $0x18] sm:$0xff] %v4368_v50  ;;  %v882_v51 = vpack.c.bf16 %v4368_v50, %v4363_v49 }
 0x243   : >> { %970 = vmatmul.bf16.gmra.mxu3 %v882_v51 }
 0x246   : >> { %v816_v18 = vpop.f32.mrf.mxu2 }
 0x247   : >> { %v4378_v53 = vadd.f32 %v3808_v20, %v816_v18 }
 0x249   : >> { %868 = vst [vmem:[%s4345_s21 + $0x20] sm:$0xff] %v4378_v53 }
 0x24e   : >> { %v818_v19 = vpop.f32.mrf.mxu2 }
 0x24f   : >> { %v4383_v54 = vadd.f32 %v3804_v21, %v818_v19  ;;  %v2999_v19 = vld [vmem:[%s5117_s5 + $0x20] sm:$0xff] }
 0x251   : >> { %869 = vst [vmem:[%s4345_s21 + $0x28] sm:$0xff] %v4383_v54  ;;  %v883_v55 = vpack.c.bf16 %v4383_v54, %v4378_v53 }
 0x253   : >> { %975 = vmatmul.bf16.gmra.mxu3 %v883_v55 }
 0x256   : >> { %v821_v20 = vpop.f32.mrf.mxu2 }
 0x257   : >> { %v4393_v58 = vadd.f32 %v3800_v22, %v821_v20 }
 0x259   : >> { %870 = vst [vmem:[%s4345_s21 + $0x30] sm:$0xff] %v4393_v58 }
 0x25e   : >> { %v823_v21 = vpop.f32.mrf.mxu2 }
 0x25f   : >> { %v4398_v59 = vadd.f32 %v3796_v23, %v823_v21 }
 0x261   : >> { %871 = vst [vmem:[%s4345_s21 + $0x38] sm:$0xff] %v4398_v59  ;;  %v884_v60 = vpack.c.bf16 %v4398_v59, %v4393_v58 }
 0x263   : >> { %980 = vmatmul.bf16.gmra.mxu3 %v884_v60 }
 0x266   : >> { %v826_v22 = vpop.f32.mrf.mxu2 }
 0x267   : >> { %v4408_v62 = vadd.f32 %v3792_v24, %v826_v22 }
 0x269   : >> { %872 = vst [vmem:[%s4345_s21 + $0x40] sm:$0xff] %v4408_v62 }
 0x26e   : >> { %v828_v23 = vpop.f32.mrf.mxu2 }
 0x26f   : >> { %v4413_v63 = vadd.f32 %v3788_v25, %v828_v23  ;;  %v2998_v23 = vld [vmem:[%s5117_s5 + $0x18] sm:$0xff] }
 0x271   : >> { %873 = vst [vmem:[%s4345_s21 + $0x48] sm:$0xff] %v4413_v63  ;;  %v885_v0 = vpack.c.bf16 %v4413_v63, %v4408_v62 }
 0x273   : >> { %985 = vmatmul.bf16.gmra.mxu3 %v885_v0 }
 0x276   : >> { %v831_v24 = vpop.f32.mrf.mxu2 }
 0x277   : >> { %v4423_v2 = vadd.f32 %v3784_v26, %v831_v24  ;;  %v2987_v26 = vld [vmem:[%s5115_s3] sm:$0xff] }
 0x278   : >> { %1105 = vmatpush.bf16.msrb.mxu0 %v2987_v26 }
 0x279   : >> { %874 = vst [vmem:[%s4345_s21 + $0x50] sm:$0xff] %v4423_v2 }
 0x27e   : >> { %v833_v25 = vpop.f32.mrf.mxu2 }
 0x27f   : >> { %v4428_v3 = vadd.f32 %v3780_v27, %v833_v25 }
 0x281   : >> { %875 = vst [vmem:[%s4345_s21 + $0x58] sm:$0xff] %v4428_v3  ;;  %v886_v4 = vpack.c.bf16 %v4428_v3, %v4423_v2 }
 0x283   : >> { %990 = vmatmul.bf16.gmra.mxu3 %v886_v4 }
 0x286   : >> { %v836_v6 = vpop.f32.mrf.mxu2 }
 0x287   : >> { %v4441_v27 = vadd.f32 %v3776_v28, %v836_v6  ;;  %v2997_v6 = vld [vmem:[%s5117_s5 + $0x10] sm:$0xff] }
 0x289   : >> { %876 = vst [vmem:[%s4345_s21 + $0x60] sm:$0xff] %v4441_v27 }
 0x28e   : >> { %v838_v7 = vpop.f32.mrf.mxu2 }
 0x28f   : >> { %v4446_v8 = vadd.f32 %v3772_v29, %v838_v7 }
 0x291   : >> { %877 = vst [vmem:[%s4345_s21 + $0x68] sm:$0xff] %v4446_v8  ;;  %v887_v9 = vpack.c.bf16 %v4446_v8, %v4441_v27 }
 0x293   : >> { %995 = vmatmul.bf16.gmra.mxu3 %v887_v9 }
 0x296   : >> { %v841_v10 = vpop.f32.mrf.mxu2 }
 0x297   : >> { %v4453_v12 = vadd.f32 %v3768_v30, %v841_v10  ;;  %v3002_v30 = vld [vmem:[%s5117_s5 + $0x38] sm:$0xff] }
 0x298   : >> { %1235 = vmatpush.bf16.msrb.mxu1 %v3002_v30  ;;  %v2996_v30 = vld [vmem:[%s5117_s5 + $0x8] sm:$0xff] }
 0x299   : >> { %878 = vst [vmem:[%s4345_s21 + $0x70] sm:$0xff] %v4453_v12 }
 0x29c   : >> { %1236 = vmatpush.bf16.msrb.mxu1 %v3001_v37  ;;  %v2995_v37 = vld [vmem:[%s5117_s5] sm:$0xff] }
 0x29e   : >> { %v843_v28 = vpop.f32.mrf.mxu2 }
 0x29f   : >> { %v4458_v13 = vadd.f32 %v3764_v31, %v843_v28 }
 0x2a0   : >> { %1237 = vmatpush.bf16.msrb.mxu1 %v3000_v45  ;;  %v3011_v45 = vld [vmem:[%s5166_s1 + $0x38] sm:$0xff] }
 0x2a1   : >> { %879 = vst [vmem:[%s4345_s21 + $0x78] sm:$0xff] %v4458_v13  ;;  %v888_v29 = vpack.c.bf16 %v4458_v13, %v4453_v12  ;;  %1395 = vmatpush.bf16.msrb.mxu2 %v3011_v45 }
 0x2a3   : >> { %1000 = vmatmul.bf16.gmra.mxu3 %v888_v29 }
 0x2a4   : >> { %1238 = vmatpush.bf16.msrb.mxu1 %v2999_v19 }
 0x2a8   : >> { %1239 = vmatpush.bf16.msrb.mxu1 %v2998_v23 }
 0x2ac   : >> { %1240 = vmatpush.bf16.msrb.mxu1 %v2997_v6 }
 0x2b0   : >> { %1241 = vmatpush.bf16.msrb.mxu1 %v2996_v30 }
 0x2b4   : >> { %1242 = vmatpush.bf16.msrb.mxu1 %v2995_v37 }
 0x2b6   : >> { %v966_v14 = vpop.f32.mrf.mxu3 }
 0x2b7   : >> { %v967_v15 = vadd.f32 %v4464_v57, %v966_v14 }
 0x2b9   : >> { %v1006_v33 = vmax.f32 %v967_v15, 0.0 }
 0x2be   : >> { %v968_v32 = vpop.f32.mrf.mxu3 }
 0x2bf   : >> { %v969_v31 = vadd.f32 %v4464_v57, %v968_v32 }
 0x2c1   : >> { %v1007_v34 = vmax.f32 %v969_v31, 0.0 }
 0x2c3   : >> { %v1022_v35 = vpack.c.bf16 %v1007_v34, %v1006_v33 }
 0x2c5   : >> { %1106 = vmatmul.bf16.vlgmr.msrb.gmra.mxu0 %v1022_v35 }
 0x2c6   : >> { %v971_v36 = vpop.f32.mrf.mxu3 }
 0x2c7   : >> { %v972_v38 = vadd.f32 %v4464_v57, %v971_v36 }
 0x2c9   : >> { %v1008_v41 = vmax.f32 %v972_v38, 0.0 }
 0x2ce   : >> { %v973_v39 = vpop.f32.mrf.mxu3 }
 0x2cf   : >> { %v974_v40 = vadd.f32 %v4464_v57, %v973_v39 }
 0x2d1   : >> { %v1009_v42 = vmax.f32 %v974_v40, 0.0 }
 0x2d3   : >> { %v1023_v11 = vpack.c.bf16 %v1009_v42, %v1008_v41 }
 0x2d5   : >> { %1111 = vmatmul.bf16.gmra.mxu0 %v1023_v11 }
 0x2d6   : >> { %v976_v43 = vpop.f32.mrf.mxu3 }
 0x2d7   : >> { %v977_v47 = vadd.f32 %v4464_v57, %v976_v43 }
 0x2d9   : >> { %v1010_v17 = vmax.f32 %v977_v47, 0.0 }
 0x2de   : >> { %v978_v48 = vpop.f32.mrf.mxu3 }
 0x2df   : >> { %v979_v16 = vadd.f32 %v4464_v57, %v978_v48  ;;  %v4509_v48 = vld [vmem:[#allocation7] ss:$0 sm:$0xff] }
 0x2e1   : >> { %v1011_v51 = vmax.f32 %v979_v16, 0.0 }
 0x2e3   : >> { %v1024_v52 = vpack.c.bf16 %v1011_v51, %v1010_v17 }
 0x2e5   : >> { %1116 = vmatmul.bf16.gmra.mxu0 %v1024_v52 }
 0x2e6   : >> { %v981_v18 = vpop.f32.mrf.mxu3 }
 0x2e7   : >> { %v982_v55 = vadd.f32 %v4464_v57, %v981_v18 }
 0x2e9   : >> { %v1012_v21 = vmax.f32 %v982_v55, 0.0 }
 0x2ee   : >> { %v983_v56 = vpop.f32.mrf.mxu3 }
 0x2ef   : >> { %v984_v20 = vadd.f32 %v4464_v57, %v983_v56 }
 0x2f1   : >> { %v1013_v60 = vmax.f32 %v984_v20, 0.0 }
 0x2f3   : >> { %v1025_v61 = vpack.c.bf16 %v1013_v60, %v1012_v21  ;;  %v3009_v60 = vld [vmem:[%s5166_s1 + $0x28] sm:$0xff] }
 0x2f5   : >> { %1121 = vmatmul.bf16.gmra.mxu0 %v1025_v61 }
 0x2f6   : >> { %v986_v22 = vpop.f32.mrf.mxu3 }
 0x2f7   : >> { %v987_v0 = vadd.f32 %v4464_v57, %v986_v22 }
 0x2f9   : >> { %v1014_v25 = vmax.f32 %v987_v0, 0.0 }
 0x2fe   : >> { %v988_v1 = vpop.f32.mrf.mxu3 }
 0x2ff   : >> { %v989_v24 = vadd.f32 %v4464_v57, %v988_v1 }
 0x301   : >> { %v1015_v4 = vmax.f32 %v989_v24, 0.0 }
 0x303   : >> { %v1026_v5 = vpack.c.bf16 %v1015_v4, %v1014_v25  ;;  %v3008_v4 = vld [vmem:[%s5166_s1 + $0x20] sm:$0xff] }
 0x305   : >> { %1126 = vmatmul.bf16.gmra.mxu0 %v1026_v5 }
 0x306   : >> { %v991_v26 = vpop.f32.mrf.mxu3 }
 0x307   : >> { %v992_v7 = vadd.f32 %v4464_v57, %v991_v26 }
 0x309   : >> { %v1016_v28 = vmax.f32 %v992_v7, 0.0 }
 0x30e   : >> { %v993_v9 = vpop.f32.mrf.mxu3 }
 0x30f   : >> { %v994_v10 = vadd.f32 %v4464_v57, %v993_v9 }
 0x311   : >> { %v1017_v29 = vmax.f32 %v994_v10, 0.0 }
 0x313   : >> { %v1027_v14 = vpack.c.bf16 %v1017_v29, %v1016_v28  ;;  %v3007_v29 = vld [vmem:[%s5166_s1 + $0x18] sm:$0xff] }
 0x315   : >> { %1131 = vmatmul.bf16.gmra.mxu0 %v1027_v14 }
 0x316   : >> { %v996_v15 = vpop.f32.mrf.mxu3 }
 0x317   : >> { %v997_v32 = vadd.f32 %v4464_v57, %v996_v15 }
 0x319   : >> { %v1018_v34 = vmax.f32 %v997_v32, 0.0 }
 0x31e   : >> { %v998_v31 = vpop.f32.mrf.mxu3 }
 0x31f   : >> { %v999_v33 = vadd.f32 %v4464_v57, %v998_v31 }
 0x321   : >> { %v1019_v35 = vmax.f32 %v999_v33, 0.0 }
 0x323   : >> { %v1028_v36 = vpack.c.bf16 %v1019_v35, %v1018_v34  ;;  %v3006_v35 = vld [vmem:[%s5166_s1 + $0x10] sm:$0xff] }
 0x325   : >> { %1136 = vmatmul.bf16.gmra.mxu0 %v1028_v36 }
 0x326   : >> { %v1001_v38 = vpop.f32.mrf.mxu3 }
 0x327   : >> { %v1002_v39 = vadd.f32 %v4464_v57, %v1001_v38 }
 0x329   : >> { %v1020_v42 = vmax.f32 %v1002_v39, 0.0 }
 0x32e   : >> { %v1003_v40 = vpop.f32.mrf.mxu3 }
 0x32f   : >> { %v1004_v41 = vadd.f32 %v4464_v57, %v1003_v40  ;;  %v3010_v57 = vld [vmem:[%s5166_s1 + $0x30] sm:$0xff] }
 0x330   : >> { %1396 = vmatpush.bf16.msrb.mxu2 %v3010_v57 }
 0x331   : >> { %v1021_v11 = vmax.f32 %v1004_v41, 0.0 }
 0x333   : >> { %v1029_v43 = vpack.c.bf16 %v1021_v11, %v1020_v42  ;;  %v3005_v11 = vld [vmem:[%s5166_s1 + $0x8] sm:$0xff] }
 0x334   : >> { %1397 = vmatpush.bf16.msrb.mxu2 %v3009_v60 }
 0x335   : >> { %1141 = vmatmul.bf16.gmra.mxu0 %v1029_v43 }
 0x338   : >> { %1398 = vmatpush.bf16.msrb.mxu2 %v3008_v4 }
 0x33c   : >> { %1399 = vmatpush.bf16.msrb.mxu2 %v3007_v29 }
 0x340   : >> { %1400 = vmatpush.bf16.msrb.mxu2 %v3006_v35 }
 0x342   : >> { %v1107_v47 = vpop.f32.mrf.mxu0 }
 0x343   : >> { %v1108_v16 = vadd.f32 %v4509_v48, %v1107_v47 }
 0x344   : >> { %1401 = vmatpush.bf16.msrb.mxu2 %v3005_v11 }
 0x345   : >> { %3376 = vtanh.f32 %v1108_v16 }
 0x34a   : >> { %v1109_v17 = vpop.f32.mrf.mxu0 }
 0x34b   : >> { %v1110_v51 = vadd.f32 %v4509_v48, %v1109_v17  ;;  %v3377_v52 = vpop.eup %3376  ;;  %v3004_v17 = vld [vmem:[%s5166_s1] sm:$0xff] }
 0x34c   : >> { %1402 = vmatpush.bf16.msrb.mxu2 %v3004_v17 }
 0x34d   : >> { %3378 = vtanh.f32 %v1110_v51 }
 0x352   : >> { %v1112_v18 = vpop.f32.mrf.mxu0 }
 0x353   : >> { %v3379_v19 = vpop.eup %3378  ;;  %v1113_v56 = vadd.f32 %v4509_v48, %v1112_v18 }
 0x354   : >> { %v1163_v55 = vpack.c.bf16 %v3379_v19, %v3377_v52 }
 0x355   : >> { %3380 = vtanh.f32 %v1113_v56 }
 0x356   : >> { %1243 = vmatmul.bf16.vlgmr.msrb.gmra.mxu1 %v1163_v55 }
 0x35a   : >> { %v1114_v20 = vpop.f32.mrf.mxu0 }
 0x35b   : >> { %v1115_v21 = vadd.f32 %v4509_v48, %v1114_v20  ;;  %v3381_v61 = vpop.eup %3380 }
 0x35d   : >> { %3382 = vtanh.f32 %v1115_v21 }
 0x362   : >> { %v1117_v22 = vpop.f32.mrf.mxu0 }
 0x363   : >> { %v3383_v23 = vpop.eup %3382  ;;  %v1118_v1 = vadd.f32 %v4509_v48, %v1117_v22 }
 0x364   : >> { %v1164_v0 = vpack.c.bf16 %v3383_v23, %v3381_v61 }
 0x365   : >> { %3384 = vtanh.f32 %v1118_v1 }
 0x366   : >> { %1248 = vmatmul.bf16.gmra.mxu1 %v1164_v0  ;;  %v3019_v0 = vld [vmem:[%s5115_s3 + $0x38] sm:$0xff] }
 0x367   : >> { %1536 = vmatpush.bf16.msrb.mxu3 %v3019_v0 }
 0x36a   : >> { %v1119_v24 = vpop.f32.mrf.mxu0 }
 0x36b   : >> { %v1120_v25 = vadd.f32 %v4509_v48, %v1119_v24  ;;  %v3385_v5 = vpop.eup %3384 }
 0x36d   : >> { %3386 = vtanh.f32 %v1120_v25 }
 0x372   : >> { %v1122_v26 = vpop.f32.mrf.mxu0 }
 0x373   : >> { %v3387_v6 = vpop.eup %3386  ;;  %v1123_v9 = vadd.f32 %v4509_v48, %v1122_v26 }
 0x374   : >> { %v1165_v7 = vpack.c.bf16 %v3387_v6, %v3385_v5  ;;  %v3018_v5 = vld [vmem:[%s5115_s3 + $0x30] sm:$0xff] }
 0x375   : >> { %3388 = vtanh.f32 %v1123_v9  ;;  %1537 = vmatpush.bf16.msrb.mxu3 %v3018_v5  ;;  %v3017_v9 = vld [vmem:[%s5115_s3 + $0x28] sm:$0xff] }
 0x376   : >> { %1253 = vmatmul.bf16.gmra.mxu1 %v1165_v7 }
 0x379   : >> { %1538 = vmatpush.bf16.msrb.mxu3 %v3017_v9 }
 0x37a   : >> { %v1124_v10 = vpop.f32.mrf.mxu0 }
 0x37b   : >> { %v1125_v28 = vadd.f32 %v4509_v48, %v1124_v10  ;;  %v3389_v14 = vpop.eup %3388 }
 0x37d   : >> { %3390 = vtanh.f32 %v1125_v28 }
 0x382   : >> { %v1127_v30 = vpop.f32.mrf.mxu0 }
 0x383   : >> { %v3391_v15 = vpop.eup %3390  ;;  %v1128_v31 = vadd.f32 %v4509_v48, %v1127_v30 }
 0x384   : >> { %v1166_v32 = vpack.c.bf16 %v3391_v15, %v3389_v14  ;;  %v3016_v14 = vld [vmem:[%s5115_s3 + $0x20] sm:$0xff] }
 0x385   : >> { %3392 = vtanh.f32 %v1128_v31  ;;  %1539 = vmatpush.bf16.msrb.mxu3 %v3016_v14  ;;  %v3015_v31 = vld [vmem:[%s5115_s3 + $0x18] sm:$0xff] }
 0x386   : >> { %1258 = vmatmul.bf16.gmra.mxu1 %v1166_v32 }
 0x389   : >> { %1540 = vmatpush.bf16.msrb.mxu3 %v3015_v31 }
 0x38a   : >> { %v1129_v33 = vpop.f32.mrf.mxu0 }
 0x38b   : >> { %v1130_v34 = vadd.f32 %v4509_v48, %v1129_v33  ;;  %v3393_v36 = vpop.eup %3392 }
 0x38d   : >> { %3394 = vtanh.f32 %v1130_v34 }
 0x392   : >> { %v1132_v37 = vpop.f32.mrf.mxu0 }
 0x393   : >> { %v3395_v38 = vpop.eup %3394  ;;  %v1133_v40 = vadd.f32 %v4509_v48, %v1132_v37 }
 0x394   : >> { %v1167_v39 = vpack.c.bf16 %v3395_v38, %v3393_v36  ;;  %v3014_v36 = vld [vmem:[%s5115_s3 + $0x10] sm:$0xff] }
 0x395   : >> { %3396 = vtanh.f32 %v1133_v40  ;;  %1541 = vmatpush.bf16.msrb.mxu3 %v3014_v36  ;;  %v3013_v40 = vld [vmem:[%s5115_s3 + $0x8] sm:$0xff] }
 0x396   : >> { %1263 = vmatmul.bf16.gmra.mxu1 %v1167_v39 }
 0x399   : >> { %1542 = vmatpush.bf16.msrb.mxu3 %v3013_v40 }
 0x39a   : >> { %v1134_v41 = vpop.f32.mrf.mxu0 }
 0x39b   : >> { %v1135_v42 = vadd.f32 %v4509_v48, %v1134_v41  ;;  %v3397_v43 = vpop.eup %3396 }
 0x39d   : >> { %3398 = vtanh.f32 %v1135_v42 }
 0x3a2   : >> { %v1137_v45 = vpop.f32.mrf.mxu0 }
 0x3a3   : >> { %v3399_v47 = vpop.eup %3398  ;;  %v1138_v51 = vadd.f32 %v4509_v48, %v1137_v45 }
 0x3a4   : >> { %v1168_v16 = vpack.c.bf16 %v3399_v47, %v3397_v43 }
 0x3a5   : >> { %3400 = vtanh.f32 %v1138_v51  ;;  %v4668_v51 = vld [vmem:[#allocation5] ss:$0 sm:$0xff] }
 0x3a6   : >> { %1268 = vmatmul.bf16.gmra.mxu1 %v1168_v16 }
 0x3aa   : >> { %v1139_v57 = vpop.f32.mrf.mxu0 }
 0x3ab   : >> { %v1140_v52 = vadd.f32 %v4509_v48, %v1139_v57  ;;  %v3401_v18 = vpop.eup %3400 }
 0x3ad   : >> { %3402 = vtanh.f32 %v1140_v52 }
 0x3b2   : >> { %v1142_v19 = vpop.f32.mrf.mxu0 }
 0x3b3   : >> { %v3403_v55 = vpop.eup %3402  ;;  %v1143_v20 = vadd.f32 %v4509_v48, %v1142_v19 }
 0x3b4   : >> { %v1169_v56 = vpack.c.bf16 %v3403_v55, %v3401_v18 }
 0x3b5   : >> { %3404 = vtanh.f32 %v1143_v20  ;;  %v3026_v20 = vld [vmem:[%s5117_s5 + $0x30] sm:$0xff] }
 0x3b6   : >> { %1273 = vmatmul.bf16.gmra.mxu1 %v1169_v56 }
 0x3ba   : >> { %v1144_v21 = vpop.f32.mrf.mxu0 }
 0x3bb   : >> { %v1145_v60 = vadd.f32 %v4509_v48, %v1144_v21  ;;  %v3405_v61 = vpop.eup %3404 }
 0x3bd   : >> { %3406 = vtanh.f32 %v1145_v60 }
 0x3c3   : >> { %v3407_v22 = vpop.eup %3406 }
 0x3c4   : >> { %v1170_v23 = vpack.c.bf16 %v3407_v22, %v3405_v61 }
 0x3c6   : >> { %1278 = vmatmul.bf16.gmra.mxu1 %v1170_v23 }
 0x3d3   : >> { %v1244_v1 = vpop.f32.mrf.mxu1 }
 0x3d4   : >> { %v4552_v24 = vadd.f32 %v1244_v1, %v4348_v44 }
 0x3d6   : >> { %2699 = vst [vmem:[%s4345_s21 + $0x80] sm:$0xff] %v4552_v24 }
 0x3db   : >> { %v1246_v48 = vpop.f32.mrf.mxu1 }
 0x3dc   : >> { %v4557_v25 = vadd.f32 %v1246_v48, %v4353_v46  ;;  %v3025_v48 = vld [vmem:[%s5117_s5 + $0x28] sm:$0xff] }
 0x3de   : >> { %2700 = vst [vmem:[%s4345_s21 + $0x88] sm:$0xff] %v4557_v25  ;;  %v1319_v4 = vpack.c.bf16 %v4557_v25, %v4552_v24 }
 0x3e0   : >> { %1403 = vmatmul.bf16.vlgmr.msrb.gmra.mxu2 %v1319_v4 }
 0x3e3   : >> { %v1249_v44 = vpop.f32.mrf.mxu1 }
 0x3e4   : >> { %v4567_v26 = vadd.f32 %v1249_v44, %v4363_v49 }
 0x3e6   : >> { %2701 = vst [vmem:[%s4345_s21 + $0x90] sm:$0xff] %v4567_v26 }
 0x3eb   : >> { %v1251_v46 = vpop.f32.mrf.mxu1 }
 0x3ec   : >> { %v4572_v6 = vadd.f32 %v1251_v46, %v4368_v50 }
 0x3ee   : >> { %2702 = vst [vmem:[%s4345_s21 + $0x98] sm:$0xff] %v4572_v6  ;;  %v1320_v7 = vpack.c.bf16 %v4572_v6, %v4567_v26 }
 0x3f0   : >> { %1408 = vmatmul.bf16.gmra.mxu2 %v1320_v7 }
 0x3f3   : >> { %v1254_v49 = vpop.f32.mrf.mxu1 }
 0x3f4   : >> { %v4582_v10 = vadd.f32 %v1254_v49, %v4378_v53 }
 0x3f6   : >> { %2703 = vst [vmem:[%s4345_s21 + $0xa0] sm:$0xff] %v4582_v10 }
 0x3fb   : >> { %v1256_v50 = vpop.f32.mrf.mxu1 }
 0x3fc   : >> { %v4587_v28 = vadd.f32 %v1256_v50, %v4383_v54  ;;  %v3024_v50 = vld [vmem:[%s5117_s5 + $0x20] sm:$0xff] }
 0x3fe   : >> { %2704 = vst [vmem:[%s4345_s21 + $0xa8] sm:$0xff] %v4587_v28  ;;  %v1321_v29 = vpack.c.bf16 %v4587_v28, %v4582_v10 }
 0x400   : >> { %1413 = vmatmul.bf16.gmra.mxu2 %v1321_v29 }
 0x403   : >> { %v1259_v53 = vpop.f32.mrf.mxu1 }
 0x404   : >> { %v4597_v30 = vadd.f32 %v1259_v53, %v4393_v58 }
 0x406   : >> { %2705 = vst [vmem:[%s4345_s21 + $0xb0] sm:$0xff] %v4597_v30 }
 0x40b   : >> { %v1261_v54 = vpop.f32.mrf.mxu1 }
 0x40c   : >> { %v4602_v15 = vadd.f32 %v1261_v54, %v4398_v59 }
 0x40e   : >> { %2706 = vst [vmem:[%s4345_s21 + $0xb8] sm:$0xff] %v4602_v15  ;;  %v1322_v32 = vpack.c.bf16 %v4602_v15, %v4597_v30 }
 0x410   : >> { %1418 = vmatmul.bf16.gmra.mxu2 %v1322_v32 }
 0x413   : >> { %v1264_v58 = vpop.f32.mrf.mxu1 }
 0x414   : >> { %v4612_v33 = vadd.f32 %v1264_v58, %v4408_v62 }
 0x416   : >> { %2707 = vst [vmem:[%s4345_s21 + $0xc0] sm:$0xff] %v4612_v33 }
 0x41b   : >> { %v1266_v59 = vpop.f32.mrf.mxu1 }
 0x41c   : >> { %v4617_v34 = vadd.f32 %v1266_v59, %v4413_v63  ;;  %v3023_v59 = vld [vmem:[%s5117_s5 + $0x18] sm:$0xff] }
 0x41e   : >> { %2708 = vst [vmem:[%s4345_s21 + $0xc8] sm:$0xff] %v4617_v34  ;;  %v1323_v35 = vpack.c.bf16 %v4617_v34, %v4612_v33 }
 0x420   : >> { %1423 = vmatmul.bf16.gmra.mxu2 %v1323_v35 }
 0x423   : >> { %v1269_v62 = vpop.f32.mrf.mxu1 }
 0x424   : >> { %v4627_v37 = vadd.f32 %v1269_v62, %v4423_v2  ;;  %v3012_v2 = vld [vmem:[%s5115_s3] sm:$0xff] }
 0x425   : >> { %1543 = vmatpush.bf16.msrb.mxu3 %v3012_v2 }
 0x426   : >> { %2709 = vst [vmem:[%s4345_s21 + $0xd0] sm:$0xff] %v4627_v37 }
 0x42b   : >> { %v1271_v63 = vpop.f32.mrf.mxu1 }
 0x42c   : >> { %v4632_v38 = vadd.f32 %v1271_v63, %v4428_v3 }
 0x42e   : >> { %2710 = vst [vmem:[%s4345_s21 + $0xd8] sm:$0xff] %v4632_v38  ;;  %v1324_v39 = vpack.c.bf16 %v4632_v38, %v4627_v37 }
 0x430   : >> { %1428 = vmatmul.bf16.gmra.mxu2 %v1324_v39 }
 0x433   : >> { %v1274_v41 = vpop.f32.mrf.mxu1 }
 0x434   : >> { %v4645_v3 = vadd.f32 %v1274_v41, %v4441_v27  ;;  %v3022_v41 = vld [vmem:[%s5117_s5 + $0x10] sm:$0xff] }
 0x436   : >> { %2711 = vst [vmem:[%s4345_s21 + $0xe0] sm:$0xff] %v4645_v3 }
 0x43b   : >> { %v1276_v42 = vpop.f32.mrf.mxu1 }
 0x43c   : >> { %v4650_v11 = vadd.f32 %v1276_v42, %v4446_v8 }
 0x43e   : >> { %2712 = vst [vmem:[%s4345_s21 + $0xe8] sm:$0xff] %v4650_v11  ;;  %v1325_v43 = vpack.c.bf16 %v4650_v11, %v4645_v3 }
 0x440   : >> { %1433 = vmatmul.bf16.gmra.mxu2 %v1325_v43 }
 0x443   : >> { %v1279_v45 = vpop.f32.mrf.mxu1 }
 0x444   : >> { %v4657_v47 = vadd.f32 %v1279_v45, %v4453_v12  ;;  %v3027_v12 = vld [vmem:[%s5117_s5 + $0x38] sm:$0xff] }
 0x445   : >> { %1673 = vmatpush.bf16.msra.mxu0 %v3027_v12  ;;  %v3021_v12 = vld [vmem:[%s5117_s5 + $0x8] sm:$0xff] }
 0x446   : >> { %2713 = vst [vmem:[%s4345_s21 + $0xf0] sm:$0xff] %v4657_v47 }
 0x449   : >> { %1674 = vmatpush.bf16.msra.mxu0 %v3026_v20 }
 0x44b   : >> { %v1281_v27 = vpop.f32.mrf.mxu1 }
 0x44c   : >> { %v4662_v16 = vadd.f32 %v1281_v27, %v4458_v13 }
 0x44d   : >> { %1675 = vmatpush.bf16.msra.mxu0 %v3025_v48  ;;  %v3036_v48 = vld [vmem:[%s5166_s1 + $0x38] sm:$0xff] }
 0x44e   : >> { %2714 = vst [vmem:[%s4345_s21 + $0xf8] sm:$0xff] %v4662_v16  ;;  %v1326_v8 = vpack.c.bf16 %v4662_v16, %v4657_v47  ;;  %1833 = vmatpush.bf16.msra.mxu1 %v3036_v48 }
 0x450   : >> { %1438 = vmatmul.bf16.gmra.mxu2 %v1326_v8 }
 0x451   : >> { %1676 = vmatpush.bf16.msra.mxu0 %v3024_v50 }
 0x455   : >> { %1677 = vmatpush.bf16.msra.mxu0 %v3023_v59 }
 0x459   : >> { %1678 = vmatpush.bf16.msra.mxu0 %v3022_v41 }
 0x45d   : >> { %1679 = vmatpush.bf16.msra.mxu0 %v3021_v12 }
 0x463   : >> { %v1404_v17 = vpop.f32.mrf.mxu2 }
 0x464   : >> { %v1405_v57 = vadd.f32 %v4668_v51, %v1404_v17 }
 0x466   : >> { %v1444_v18 = vmax.f32 %v1405_v57, 0.0 }
 0x46b   : >> { %v1406_v52 = vpop.f32.mrf.mxu2 }
 0x46c   : >> { %v1407_v13 = vadd.f32 %v4668_v51, %v1406_v52 }
 0x46e   : >> { %v1445_v19 = vmax.f32 %v1407_v13, 0.0 }
 0x470   : >> { %v1460_v55 = vpack.c.bf16 %v1445_v19, %v1444_v18 }
 0x472   : >> { %1544 = vmatmul.bf16.vlgmr.msrb.gmra.mxu3 %v1460_v55 }
 0x473   : >> { %v1409_v56 = vpop.f32.mrf.mxu2 }
 0x474   : >> { %v1410_v21 = vadd.f32 %v4668_v51, %v1409_v56 }
 0x476   : >> { %v1446_v22 = vmax.f32 %v1410_v21, 0.0  ;;  %v3020_v21 = vld [vmem:[%s5117_s5] sm:$0xff] }
 0x477   : >> { %1680 = vmatpush.bf16.msra.mxu0 %v3020_v21 }
 0x47b   : >> { %v1411_v60 = vpop.f32.mrf.mxu2 }
 0x47c   : >> { %v1412_v61 = vadd.f32 %v4668_v51, %v1411_v60 }
 0x47e   : >> { %v1447_v23 = vmax.f32 %v1412_v61, 0.0 }
 0x480   : >> { %v1461_v0 = vpack.c.bf16 %v1447_v23, %v1446_v22 }
 0x482   : >> { %1549 = vmatmul.bf16.gmra.mxu3 %v1461_v0 }
 0x483   : >> { %v1414_v1 = vpop.f32.mrf.mxu2 }
 0x484   : >> { %v1415_v4 = vadd.f32 %v4668_v51, %v1414_v1 }
 0x486   : >> { %v1448_v46 = vmax.f32 %v1415_v4, 0.0 }
 0x48b   : >> { %v1416_v5 = vpop.f32.mrf.mxu2 }
 0x48c   : >> { %v1417_v44 = vadd.f32 %v4668_v51, %v1416_v5  ;;  %v4713_v5 = vld [vmem:[#allocation7] ss:$0 sm:$0xff] }
 0x48e   : >> { %v1449_v7 = vmax.f32 %v1417_v44, 0.0 }
 0x490   : >> { %v1462_v9 = vpack.c.bf16 %v1449_v7, %v1448_v46 }
 0x492   : >> { %1554 = vmatmul.bf16.gmra.mxu3 %v1462_v9 }
 0x493   : >> { %v1419_v49 = vpop.f32.mrf.mxu2 }
 0x494   : >> { %v1420_v29 = vadd.f32 %v4668_v51, %v1419_v49 }
 0x496   : >> { %v1450_v54 = vmax.f32 %v1420_v29, 0.0 }
 0x49b   : >> { %v1421_v14 = vpop.f32.mrf.mxu2 }
 0x49c   : >> { %v1422_v53 = vadd.f32 %v4668_v51, %v1421_v14 }
 0x49e   : >> { %v1451_v32 = vmax.f32 %v1422_v53, 0.0 }
 0x4a0   : >> { %v1463_v31 = vpack.c.bf16 %v1451_v32, %v1450_v54  ;;  %v3034_v32 = vld [vmem:[%s5166_s1 + $0x28] sm:$0xff] }
 0x4a2   : >> { %1559 = vmatmul.bf16.gmra.mxu3 %v1463_v31 }
 0x4a3   : >> { %v1424_v58 = vpop.f32.mrf.mxu2 }
 0x4a4   : >> { %v1425_v35 = vadd.f32 %v4668_v51, %v1424_v58 }
 0x4a6   : >> { %v1452_v63 = vmax.f32 %v1425_v35, 0.0 }
 0x4ab   : >> { %v1426_v36 = vpop.f32.mrf.mxu2 }
 0x4ac   : >> { %v1427_v62 = vadd.f32 %v4668_v51, %v1426_v36 }
 0x4ae   : >> { %v1453_v39 = vmax.f32 %v1427_v62, 0.0 }
 0x4b0   : >> { %v1464_v40 = vpack.c.bf16 %v1453_v39, %v1452_v63  ;;  %v3033_v39 = vld [vmem:[%s5166_s1 + $0x20] sm:$0xff] }
 0x4b2   : >> { %1564 = vmatmul.bf16.gmra.mxu3 %v1464_v40 }
 0x4b3   : >> { %v1429_v2 = vpop.f32.mrf.mxu2 }
 0x4b4   : >> { %v1430_v42 = vadd.f32 %v4668_v51, %v1429_v2 }
 0x4b6   : >> { %v1454_v27 = vmax.f32 %v1430_v42, 0.0 }
 0x4bb   : >> { %v1431_v43 = vpop.f32.mrf.mxu2 }
 0x4bc   : >> { %v1432_v45 = vadd.f32 %v4668_v51, %v1431_v43 }
 0x4be   : >> { %v1455_v8 = vmax.f32 %v1432_v45, 0.0 }
 0x4c0   : >> { %v1465_v17 = vpack.c.bf16 %v1455_v8, %v1454_v27  ;;  %v3032_v8 = vld [vmem:[%s5166_s1 + $0x18] sm:$0xff] }
 0x4c2   : >> { %1569 = vmatmul.bf16.gmra.mxu3 %v1465_v17 }
 0x4c3   : >> { %v1434_v57 = vpop.f32.mrf.mxu2 }
 0x4c4   : >> { %v1435_v52 = vadd.f32 %v4668_v51, %v1434_v57 }
 0x4c6   : >> { %v1456_v19 = vmax.f32 %v1435_v52, 0.0 }
 0x4cb   : >> { %v1436_v13 = vpop.f32.mrf.mxu2 }
 0x4cc   : >> { %v1437_v18 = vadd.f32 %v4668_v51, %v1436_v13 }
 0x4ce   : >> { %v1457_v55 = vmax.f32 %v1437_v18, 0.0 }
 0x4d0   : >> { %v1466_v56 = vpack.c.bf16 %v1457_v55, %v1456_v19  ;;  %v3031_v55 = vld [vmem:[%s5166_s1 + $0x10] sm:$0xff] }
 0x4d2   : >> { %1574 = vmatmul.bf16.gmra.mxu3 %v1466_v56 }
 0x4d3   : >> { %v1439_v20 = vpop.f32.mrf.mxu2 }
 0x4d4   : >> { %v1440_v60 = vadd.f32 %v4668_v51, %v1439_v20 }
 0x4d6   : >> { %v1458_v23 = vmax.f32 %v1440_v60, 0.0 }
 0x4db   : >> { %v1441_v61 = vpop.f32.mrf.mxu2 }
 0x4dc   : >> { %v1442_v22 = vadd.f32 %v4668_v51, %v1441_v61  ;;  %v3035_v51 = vld [vmem:[%s5166_s1 + $0x30] sm:$0xff] }
 0x4dd   : >> { %1834 = vmatpush.bf16.msra.mxu1 %v3035_v51 }
 0x4de   : >> { %v1459_v0 = vmax.f32 %v1442_v22, 0.0 }
 0x4e0   : >> { %v1467_v1 = vpack.c.bf16 %v1459_v0, %v1458_v23  ;;  %v3030_v0 = vld [vmem:[%s5166_s1 + $0x8] sm:$0xff] }
 0x4e1   : >> { %1835 = vmatpush.bf16.msra.mxu1 %v3034_v32 }
 0x4e2   : >> { %1579 = vmatmul.bf16.gmra.mxu3 %v1467_v1 }
 0x4e5   : >> { %1836 = vmatpush.bf16.msra.mxu1 %v3033_v39 }
 0x4e9   : >> { %1837 = vmatpush.bf16.msra.mxu1 %v3032_v8 }
 0x4ed   : >> { %1838 = vmatpush.bf16.msra.mxu1 %v3031_v55 }
 0x4f1   : >> { %1839 = vmatpush.bf16.msra.mxu1 %v3030_v0 }
 0x4f5   : >> { %v1545_v4 = vpop.f32.mrf.mxu3 }
 0x4f6   : >> { %v1546_v44 = vadd.f32 %v4713_v5, %v1545_v4 }
 0x4f8   : >> { %3408 = vtanh.f32 %v1546_v44 }
 0x4fd   : >> { %v1547_v46 = vpop.f32.mrf.mxu3 }
 0x4fe   : >> { %v1548_v7 = vadd.f32 %v4713_v5, %v1547_v46  ;;  %v3409_v9 = vpop.eup %3408  ;;  %v3029_v46 = vld [vmem:[%s5166_s1] sm:$0xff] }
 0x4ff   : >> { %1840 = vmatpush.bf16.msra.mxu1 %v3029_v46 }
 0x500   : >> { %3410 = vtanh.f32 %v1548_v7 }
 0x505   : >> { %v1550_v49 = vpop.f32.mrf.mxu3 }
 0x506   : >> { %v3411_v50 = vpop.eup %3410  ;;  %v1551_v14 = vadd.f32 %v4713_v5, %v1550_v49 }
 0x507   : >> { %v1601_v29 = vpack.c.bf16 %v3411_v50, %v3409_v9 }
 0x508   : >> { %3412 = vtanh.f32 %v1551_v14 }
 0x509   : >> { %1681 = vmatmul.bf16.vlgmr.msra.gmra.mxu0 %v1601_v29 }
 0x50d   : >> { %v1552_v53 = vpop.f32.mrf.mxu3 }
 0x50e   : >> { %v1553_v54 = vadd.f32 %v4713_v5, %v1552_v53  ;;  %v3413_v31 = vpop.eup %3412 }
 0x510   : >> { %3414 = vtanh.f32 %v1553_v54 }
 0x515   : >> { %v1555_v58 = vpop.f32.mrf.mxu3 }
 0x516   : >> { %v3415_v59 = vpop.eup %3414  ;;  %v1556_v36 = vadd.f32 %v4713_v5, %v1555_v58 }
 0x517   : >> { %v1602_v35 = vpack.c.bf16 %v3415_v59, %v3413_v31 }
 0x518   : >> { %3416 = vtanh.f32 %v1556_v36 }
 0x519   : >> { %1686 = vmatmul.bf16.gmra.mxu0 %v1602_v35  ;;  %v3044_v35 = vld [vmem:[%s5115_s3 + $0x38] sm:$0xff] }
 0x51a   : >> { %1974 = vmatpush.bf16.msra.mxu2 %v3044_v35 }
 0x51d   : >> { %v1557_v62 = vpop.f32.mrf.mxu3 }
 0x51e   : >> { %v1558_v63 = vadd.f32 %v4713_v5, %v1557_v62  ;;  %v3417_v40 = vpop.eup %3416 }
 0x520   : >> { %3418 = vtanh.f32 %v1558_v63 }
 0x525   : >> { %v1560_v2 = vpop.f32.mrf.mxu3 }
 0x526   : >> { %v3419_v41 = vpop.eup %3418  ;;  %v1561_v43 = vadd.f32 %v4713_v5, %v1560_v2 }
 0x527   : >> { %v1603_v42 = vpack.c.bf16 %v3419_v41, %v3417_v40  ;;  %v3043_v40 = vld [vmem:[%s5115_s3 + $0x30] sm:$0xff] }
 0x528   : >> { %3420 = vtanh.f32 %v1561_v43  ;;  %1975 = vmatpush.bf16.msra.mxu2 %v3043_v40  ;;  %v3042_v43 = vld [vmem:[%s5115_s3 + $0x28] sm:$0xff] }
 0x529   : >> { %1691 = vmatmul.bf16.gmra.mxu0 %v1603_v42 }
 0x52c   : >> { %1976 = vmatpush.bf16.msra.mxu2 %v3042_v43 }
 0x52d   : >> { %v1562_v45 = vpop.f32.mrf.mxu3 }
 0x52e   : >> { %v1563_v27 = vadd.f32 %v4713_v5, %v1562_v45  ;;  %v3421_v17 = vpop.eup %3420 }
 0x530   : >> { %3422 = vtanh.f32 %v1563_v27 }
 0x535   : >> { %v1565_v12 = vpop.f32.mrf.mxu3 }
 0x536   : >> { %v3423_v57 = vpop.eup %3422  ;;  %v1566_v13 = vadd.f32 %v4713_v5, %v1565_v12 }
 0x537   : >> { %v1604_v52 = vpack.c.bf16 %v3423_v57, %v3421_v17  ;;  %v3041_v17 = vld [vmem:[%s5115_s3 + $0x20] sm:$0xff] }
 0x538   : >> { %3424 = vtanh.f32 %v1566_v13  ;;  %1977 = vmatpush.bf16.msra.mxu2 %v3041_v17  ;;  %v3040_v13 = vld [vmem:[%s5115_s3 + $0x18] sm:$0xff] }
 0x539   : >> { %1696 = vmatmul.bf16.gmra.mxu0 %v1604_v52 }
 0x53c   : >> { %1978 = vmatpush.bf16.msra.mxu2 %v3040_v13 }
 0x53d   : >> { %v1567_v18 = vpop.f32.mrf.mxu3 }
 0x53e   : >> { %v1568_v19 = vadd.f32 %v4713_v5, %v1567_v18  ;;  %v3425_v56 = vpop.eup %3424 }
 0x540   : >> { %3426 = vtanh.f32 %v1568_v19 }
 0x545   : >> { %v1570_v20 = vpop.f32.mrf.mxu3 }
 0x546   : >> { %v3427_v21 = vpop.eup %3426  ;;  %v1571_v61 = vadd.f32 %v4713_v5, %v1570_v20 }
 0x547   : >> { %v1605_v60 = vpack.c.bf16 %v3427_v21, %v3425_v56  ;;  %v3039_v56 = vld [vmem:[%s5115_s3 + $0x10] sm:$0xff] }
 0x548   : >> { %3428 = vtanh.f32 %v1571_v61  ;;  %1979 = vmatpush.bf16.msra.mxu2 %v3039_v56  ;;  %v3038_v61 = vld [vmem:[%s5115_s3 + $0x8] sm:$0xff] }
 0x549   : >> { %1701 = vmatmul.bf16.gmra.mxu0 %v1605_v60 }
 0x54c   : >> { %1980 = vmatpush.bf16.msra.mxu2 %v3038_v61 }
 0x54d   : >> { %v1572_v22 = vpop.f32.mrf.mxu3 }
 0x54e   : >> { %v1573_v23 = vadd.f32 %v4713_v5, %v1572_v22  ;;  %v3429_v1 = vpop.eup %3428 }
 0x550   : >> { %3430 = vtanh.f32 %v1573_v23 }
 0x555   : >> { %v1575_v48 = vpop.f32.mrf.mxu3 }
 0x556   : >> { %v3431_v4 = vpop.eup %3430  ;;  %v1576_v7 = vadd.f32 %v4713_v5, %v1575_v48 }
 0x557   : >> { %v1606_v44 = vpack.c.bf16 %v3431_v4, %v3429_v1 }
 0x558   : >> { %3432 = vtanh.f32 %v1576_v7  ;;  %v4872_v7 = vld [vmem:[#allocation5] ss:$0 sm:$0xff] }
 0x559   : >> { %1706 = vmatmul.bf16.gmra.mxu0 %v1606_v44 }
 0x55d   : >> { %v1577_v51 = vpop.f32.mrf.mxu3 }
 0x55e   : >> { %v1578_v9 = vadd.f32 %v4713_v5, %v1577_v51  ;;  %v3433_v49 = vpop.eup %3432 }
 0x560   : >> { %3434 = vtanh.f32 %v1578_v9 }
 0x565   : >> { %v1580_v50 = vpop.f32.mrf.mxu3 }
 0x566   : >> { %v3435_v29 = vpop.eup %3434  ;;  %v1581_v53 = vadd.f32 %v4713_v5, %v1580_v50 }
 0x567   : >> { %v1607_v14 = vpack.c.bf16 %v3435_v29, %v3433_v49 }
 0x568   : >> { %3436 = vtanh.f32 %v1581_v53  ;;  %v3051_v53 = vld [vmem:[%s5117_s5 + $0x30] sm:$0xff] }
 0x569   : >> { %1711 = vmatmul.bf16.gmra.mxu0 %v1607_v14 }
 0x56d   : >> { %v1582_v54 = vpop.f32.mrf.mxu3 }
 0x56e   : >> { %v1583_v32 = vadd.f32 %v4713_v5, %v1582_v54  ;;  %v3437_v31 = vpop.eup %3436 }
 0x570   : >> { %3438 = vtanh.f32 %v1583_v32 }
 0x576   : >> { %v3439_v58 = vpop.eup %3438 }
 0x577   : >> { %v1608_v59 = vpack.c.bf16 %v3439_v58, %v3437_v31 }
 0x579   : >> { %1716 = vmatmul.bf16.gmra.mxu0 %v1608_v59 }
 0x586   : >> { %v1682_v36 = vpop.f32.mrf.mxu0 }
 0x587   : >> { %v4756_v62 = vadd.f32 %v1682_v36, %v4552_v24 }
 0x589   : >> { %2813 = vst [vmem:[%s4345_s21 + $0x100] sm:$0xff] %v4756_v62 }
 0x58e   : >> { %v1684_v5 = vpop.f32.mrf.mxu0 }
 0x58f   : >> { %v4761_v63 = vadd.f32 %v1684_v5, %v4557_v25  ;;  %v3050_v5 = vld [vmem:[%s5117_s5 + $0x28] sm:$0xff] }
 0x591   : >> { %2814 = vst [vmem:[%s4345_s21 + $0x108] sm:$0xff] %v4761_v63  ;;  %v1757_v39 = vpack.c.bf16 %v4761_v63, %v4756_v62 }
 0x593   : >> { %1841 = vmatmul.bf16.vlgmr.msra.gmra.mxu1 %v1757_v39 }
 0x596   : >> { %v1687_v24 = vpop.f32.mrf.mxu0 }
 0x597   : >> { %v4771_v2 = vadd.f32 %v1687_v24, %v4567_v26 }
 0x599   : >> { %2815 = vst [vmem:[%s4345_s21 + $0x110] sm:$0xff] %v4771_v2 }
 0x59e   : >> { %v1689_v25 = vpop.f32.mrf.mxu0 }
 0x59f   : >> { %v4776_v41 = vadd.f32 %v1689_v25, %v4572_v6 }
 0x5a1   : >> { %2816 = vst [vmem:[%s4345_s21 + $0x118] sm:$0xff] %v4776_v41  ;;  %v1758_v42 = vpack.c.bf16 %v4776_v41, %v4771_v2 }
 0x5a3   : >> { %1846 = vmatmul.bf16.gmra.mxu1 %v1758_v42 }
 0x5a6   : >> { %v1692_v26 = vpop.f32.mrf.mxu0 }
 0x5a7   : >> { %v4786_v45 = vadd.f32 %v1692_v26, %v4582_v10 }
 0x5a9   : >> { %2817 = vst [vmem:[%s4345_s21 + $0x120] sm:$0xff] %v4786_v45 }
 0x5ae   : >> { %v1694_v6 = vpop.f32.mrf.mxu0 }
 0x5af   : >> { %v4791_v27 = vadd.f32 %v1694_v6, %v4587_v28  ;;  %v3049_v6 = vld [vmem:[%s5117_s5 + $0x20] sm:$0xff] }
 0x5b1   : >> { %2818 = vst [vmem:[%s4345_s21 + $0x128] sm:$0xff] %v4791_v27  ;;  %v1759_v8 = vpack.c.bf16 %v4791_v27, %v4786_v45 }
 0x5b3   : >> { %1851 = vmatmul.bf16.gmra.mxu1 %v1759_v8 }
 0x5b6   : >> { %v1697_v10 = vpop.f32.mrf.mxu0 }
 0x5b7   : >> { %v4801_v12 = vadd.f32 %v1697_v10, %v4597_v30 }
 0x5b9   : >> { %2819 = vst [vmem:[%s4345_s21 + $0x130] sm:$0xff] %v4801_v12 }
 0x5be   : >> { %v1699_v28 = vpop.f32.mrf.mxu0 }
 0x5bf   : >> { %v4806_v57 = vadd.f32 %v1699_v28, %v4602_v15 }
 0x5c1   : >> { %2820 = vst [vmem:[%s4345_s21 + $0x138] sm:$0xff] %v4806_v57  ;;  %v1760_v52 = vpack.c.bf16 %v4806_v57, %v4801_v12 }
 0x5c3   : >> { %1856 = vmatmul.bf16.gmra.mxu1 %v1760_v52 }
 0x5c6   : >> { %v1702_v30 = vpop.f32.mrf.mxu0 }
 0x5c7   : >> { %v4816_v18 = vadd.f32 %v1702_v30, %v4612_v33 }
 0x5c9   : >> { %2821 = vst [vmem:[%s4345_s21 + $0x140] sm:$0xff] %v4816_v18 }
 0x5ce   : >> { %v1704_v15 = vpop.f32.mrf.mxu0 }
 0x5cf   : >> { %v4821_v19 = vadd.f32 %v1704_v15, %v4617_v34  ;;  %v3048_v15 = vld [vmem:[%s5117_s5 + $0x18] sm:$0xff] }
 0x5d1   : >> { %2822 = vst [vmem:[%s4345_s21 + $0x148] sm:$0xff] %v4821_v19  ;;  %v1761_v55 = vpack.c.bf16 %v4821_v19, %v4816_v18 }
 0x5d3   : >> { %1861 = vmatmul.bf16.gmra.mxu1 %v1761_v55 }
 0x5d6   : >> { %v1707_v33 = vpop.f32.mrf.mxu0 }
 0x5d7   : >> { %v4831_v20 = vadd.f32 %v1707_v33, %v4627_v37  ;;  %v3037_v37 = vld [vmem:[%s5115_s3] sm:$0xff] }
 0x5d8   : >> { %1981 = vmatpush.bf16.msra.mxu2 %v3037_v37 }
 0x5d9   : >> { %2823 = vst [vmem:[%s4345_s21 + $0x150] sm:$0xff] %v4831_v20 }
 0x5de   : >> { %v1709_v34 = vpop.f32.mrf.mxu0 }
 0x5df   : >> { %v4836_v21 = vadd.f32 %v1709_v34, %v4632_v38 }
 0x5e1   : >> { %2824 = vst [vmem:[%s4345_s21 + $0x158] sm:$0xff] %v4836_v21  ;;  %v1762_v60 = vpack.c.bf16 %v4836_v21, %v4831_v20 }
 0x5e3   : >> { %1866 = vmatmul.bf16.gmra.mxu1 %v1762_v60 }
 0x5e6   : >> { %v1712_v22 = vpop.f32.mrf.mxu0 }
 0x5e7   : >> { %v4849_v38 = vadd.f32 %v1712_v22, %v4645_v3  ;;  %v3047_v22 = vld [vmem:[%s5117_s5 + $0x10] sm:$0xff] }
 0x5e9   : >> { %2825 = vst [vmem:[%s4345_s21 + $0x160] sm:$0xff] %v4849_v38 }
 0x5ee   : >> { %v1714_v23 = vpop.f32.mrf.mxu0 }
 0x5ef   : >> { %v4854_v0 = vadd.f32 %v1714_v23, %v4650_v11 }
 0x5f1   : >> { %2826 = vst [vmem:[%s4345_s21 + $0x168] sm:$0xff] %v4854_v0  ;;  %v1763_v1 = vpack.c.bf16 %v4854_v0, %v4849_v38 }
 0x5f3   : >> { %1871 = vmatmul.bf16.gmra.mxu1 %v1763_v1 }
 0x5f6   : >> { %v1717_v48 = vpop.f32.mrf.mxu0 }
 0x5f7   : >> { %v4861_v4 = vadd.f32 %v1717_v48, %v4657_v47  ;;  %v3052_v47 = vld [vmem:[%s5117_s5 + $0x38] sm:$0xff] }
 0x5f8   : >> { %2111 = vmatpush.bf16.msra.mxu3 %v3052_v47  ;;  %v3046_v47 = vld [vmem:[%s5117_s5 + $0x8] sm:$0xff] }
 0x5f9   : >> { %2827 = vst [vmem:[%s4345_s21 + $0x170] sm:$0xff] %v4861_v4 }
 0x5fc   : >> { %2112 = vmatpush.bf16.msra.mxu3 %v3051_v53 }
 0x5fe   : >> { %v1719_v3 = vpop.f32.mrf.mxu0 }
 0x5ff   : >> { %v4866_v44 = vadd.f32 %v1719_v3, %v4662_v16 }
 0x600   : >> { %2113 = vmatpush.bf16.msra.mxu3 %v3050_v5 }
 0x601   : >> { %2828 = vst [vmem:[%s4345_s21 + $0x178] sm:$0xff] %v4866_v44  ;;  %v1764_v11 = vpack.c.bf16 %v4866_v44, %v4861_v4 }
 0x603   : >> { %1876 = vmatmul.bf16.gmra.mxu1 %v1764_v11 }
 0x604   : >> { %2114 = vmatpush.bf16.msra.mxu3 %v3049_v6 }
 0x608   : >> { %2115 = vmatpush.bf16.msra.mxu3 %v3048_v15 }
 0x60c   : >> { %2116 = vmatpush.bf16.msra.mxu3 %v3047_v22 }
 0x610   : >> { %v1842_v46 = vpop.f32.mrf.mxu1  ;;  %2117 = vmatpush.bf16.msra.mxu3 %v3046_v47 }
 0x611   : >> { %v1843_v51 = vadd.f32 %v4872_v7, %v1842_v46 }
 0x613   : >> { %v1882_v49 = vmax.f32 %v1843_v51, 0.0 }
 0x618   : >> { %v1844_v9 = vpop.f32.mrf.mxu1 }
 0x619   : >> { %v1845_v16 = vadd.f32 %v4872_v7, %v1844_v9 }
 0x61b   : >> { %v1883_v50 = vmax.f32 %v1845_v16, 0.0 }
 0x61d   : >> { %v1898_v29 = vpack.c.bf16 %v1883_v50, %v1882_v49 }
 0x61f   : >> { %1982 = vmatmul.bf16.vlgmr.msra.gmra.mxu2 %v1898_v29 }
 0x620   : >> { %v1847_v14 = vpop.f32.mrf.mxu1 }
 0x621   : >> { %v1848_v54 = vadd.f32 %v4872_v7, %v1847_v14 }
 0x623   : >> { %v1884_v58 = vmax.f32 %v1848_v54, 0.0  ;;  %v3045_v54 = vld [vmem:[%s5117_s5] sm:$0xff] }
 0x624   : >> { %2118 = vmatpush.bf16.msra.mxu3 %v3045_v54 }
 0x628   : >> { %v1849_v32 = vpop.f32.mrf.mxu1 }
 0x629   : >> { %v1850_v31 = vadd.f32 %v4872_v7, %v1849_v32 }
 0x62b   : >> { %v1885_v59 = vmax.f32 %v1850_v31, 0.0 }
 0x62d   : >> { %v1899_v35 = vpack.c.bf16 %v1885_v59, %v1884_v58 }
 0x62f   : >> { %1987 = vmatmul.bf16.gmra.mxu2 %v1899_v35 }
 0x630   : >> { %v1852_v36 = vpop.f32.mrf.mxu1 }
 0x631   : >> { %v1853_v39 = vadd.f32 %v4872_v7, %v1852_v36 }
 0x633   : >> { %v1886_v25 = vmax.f32 %v1853_v39, 0.0  ;;  %v4914_v39 = vld [vmem:[#allocation7] ss:$0 sm:$0xff] }
 0x638   : >> { %v1854_v40 = vpop.f32.mrf.mxu1 }
 0x639   : >> { %v1855_v24 = vadd.f32 %v4872_v7, %v1854_v40 }
 0x63b   : >> { %v1887_v42 = vmax.f32 %v1855_v24, 0.0 }
 0x63d   : >> { %v1900_v43 = vpack.c.bf16 %v1887_v42, %v1886_v25 }
 0x63f   : >> { %1992 = vmatmul.bf16.gmra.mxu2 %v1900_v43 }
 0x640   : >> { %v1857_v26 = vpop.f32.mrf.mxu1 }
 0x641   : >> { %v1858_v8 = vadd.f32 %v4872_v7, %v1857_v26 }
 0x643   : >> { %v1888_v28 = vmax.f32 %v1858_v8, 0.0 }
 0x648   : >> { %v1859_v17 = vpop.f32.mrf.mxu1 }
 0x649   : >> { %v1860_v10 = vadd.f32 %v4872_v7, %v1859_v17 }
 0x64b   : >> { %v1889_v52 = vmax.f32 %v1860_v10, 0.0 }
 0x64d   : >> { %v1901_v13 = vpack.c.bf16 %v1889_v52, %v1888_v28 }
 0x64f   : >> { %1997 = vmatmul.bf16.gmra.mxu2 %v1901_v13 }
 0x650   : >> { %v1862_v30 = vpop.f32.mrf.mxu1 }
 0x651   : >> { %v1863_v55 = vadd.f32 %v4872_v7, %v1862_v30 }
 0x653   : >> { %v1890_v34 = vmax.f32 %v1863_v55, 0.0 }
 0x658   : >> { %v1864_v56 = vpop.f32.mrf.mxu1 }
 0x659   : >> { %v1865_v33 = vadd.f32 %v4872_v7, %v1864_v56 }
 0x65b   : >> { %v1891_v60 = vmax.f32 %v1865_v33, 0.0 }
 0x65d   : >> { %v1902_v61 = vpack.c.bf16 %v1891_v60, %v1890_v34 }
 0x65f   : >> { %2002 = vmatmul.bf16.gmra.mxu2 %v1902_v61 }
 0x660   : >> { %v1867_v37 = vpop.f32.mrf.mxu1 }
 0x661   : >> { %v1868_v23 = vadd.f32 %v4872_v7, %v1867_v37 }
 0x663   : >> { %v1892_v3 = vmax.f32 %v1868_v23, 0.0 }
 0x668   : >> { %v1869_v1 = vpop.f32.mrf.mxu1 }
 0x669   : >> { %v1870_v48 = vadd.f32 %v4872_v7, %v1869_v1 }
 0x66b   : >> { %v1893_v11 = vmax.f32 %v1870_v48, 0.0 }
 0x66d   : >> { %v1903_v46 = vpack.c.bf16 %v1893_v11, %v1892_v3 }
 0x66f   : >> { %2007 = vmatmul.bf16.gmra.mxu2 %v1903_v46 }
 0x670   : >> { %v1872_v51 = vpop.f32.mrf.mxu1 }
 0x671   : >> { %v1873_v9 = vadd.f32 %v4872_v7, %v1872_v51 }
 0x673   : >> { %v1894_v50 = vmax.f32 %v1873_v9, 0.0 }
 0x678   : >> { %v1874_v16 = vpop.f32.mrf.mxu1 }
 0x679   : >> { %v1875_v49 = vadd.f32 %v4872_v7, %v1874_v16 }
 0x67b   : >> { %v1895_v29 = vmax.f32 %v1875_v49, 0.0 }
 0x67d   : >> { %v1904_v14 = vpack.c.bf16 %v1895_v29, %v1894_v50 }
 0x67f   : >> { %2012 = vmatmul.bf16.gmra.mxu2 %v1904_v14 }
 0x680   : >> { %v1877_v53 = vpop.f32.mrf.mxu1 }
 0x681   : >> { %v1878_v32 = vadd.f32 %v4872_v7, %v1877_v53 }
 0x683   : >> { %v1896_v59 = vmax.f32 %v1878_v32, 0.0 }
 0x688   : >> { %v1879_v31 = vpop.f32.mrf.mxu1 }
 0x689   : >> { %v1880_v58 = vadd.f32 %v4872_v7, %v1879_v31 }
 0x68b   : >> { %v1897_v35 = vmax.f32 %v1880_v58, 0.0 }
 0x68d   : >> { %v1905_v36 = vpack.c.bf16 %v1897_v35, %v1896_v59 }
 0x68f   : >> { %2017 = vmatmul.bf16.gmra.mxu2 %v1905_v36 }
 0x6a2   : >> { %v1983_v5 = vpop.f32.mrf.mxu2 }
 0x6a3   : >> { %v1984_v40 = vadd.f32 %v4914_v39, %v1983_v5 }
 0x6a5   : >> { %3440 = vtanh.f32 %v1984_v40 }
 0x6aa   : >> { %v1985_v24 = vpop.f32.mrf.mxu2 }
 0x6ab   : >> { %v1986_v25 = vadd.f32 %v4914_v39, %v1985_v24  ;;  %v3441_v42 = vpop.eup %3440 }
 0x6ad   : >> { %3442 = vtanh.f32 %v1986_v25 }
 0x6b2   : >> { %v1988_v43 = vpop.f32.mrf.mxu2 }
 0x6b3   : >> { %v3443_v26 = vpop.eup %3442  ;;  %v1989_v7 = vadd.f32 %v4914_v39, %v1988_v43 }
 0x6b4   : >> { %v2039_v6 = vpack.c.bf16 %v3443_v26, %v3441_v42 }
 0x6b5   : >> { %3444 = vtanh.f32 %v1989_v7 }
 0x6b6   : >> { %2119 = vmatmul.bf16.vlgmr.msra.gmra.mxu3 %v2039_v6 }
 0x6ba   : >> { %v1990_v8 = vpop.f32.mrf.mxu2 }
 0x6bb   : >> { %v1991_v17 = vadd.f32 %v4914_v39, %v1990_v8  ;;  %v3445_v10 = vpop.eup %3444 }
 0x6bd   : >> { %3446 = vtanh.f32 %v1991_v17 }
 0x6c2   : >> { %v1993_v28 = vpop.f32.mrf.mxu2 }
 0x6c3   : >> { %v3447_v52 = vpop.eup %3446  ;;  %v1994_v30 = vadd.f32 %v4914_v39, %v1993_v28 }
 0x6c4   : >> { %v2040_v13 = vpack.c.bf16 %v3447_v52, %v3445_v10 }
 0x6c5   : >> { %3448 = vtanh.f32 %v1994_v30 }
 0x6c6   : >> { %2124 = vmatmul.bf16.gmra.mxu3 %v2040_v13 }
 0x6ca   : >> { %v1995_v15 = vpop.f32.mrf.mxu2 }
 0x6cb   : >> { %v1996_v55 = vadd.f32 %v4914_v39, %v1995_v15  ;;  %v3449_v56 = vpop.eup %3448 }
 0x6cd   : >> { %3450 = vtanh.f32 %v1996_v55 }
 0x6d2   : >> { %v1998_v33 = vpop.f32.mrf.mxu2 }
 0x6d3   : >> { %v3451_v34 = vpop.eup %3450  ;;  %v1999_v61 = vadd.f32 %v4914_v39, %v1998_v33 }
 0x6d4   : >> { %v2041_v60 = vpack.c.bf16 %v3451_v34, %v3449_v56 }
 0x6d5   : >> { %3452 = vtanh.f32 %v1999_v61 }
 0x6d6   : >> { %2129 = vmatmul.bf16.gmra.mxu3 %v2041_v60 }
 0x6da   : >> { %v2000_v37 = vpop.f32.mrf.mxu2 }
 0x6db   : >> { %v2001_v22 = vadd.f32 %v4914_v39, %v2000_v37  ;;  %v3453_v23 = vpop.eup %3452 }
 0x6dd   : >> { %3454 = vtanh.f32 %v2001_v22 }
 0x6e2   : >> { %v2003_v1 = vpop.f32.mrf.mxu2 }
 0x6e3   : >> { %v3455_v48 = vpop.eup %3454  ;;  %v2004_v11 = vadd.f32 %v4914_v39, %v2003_v1 }
 0x6e4   : >> { %v2042_v3 = vpack.c.bf16 %v3455_v48, %v3453_v23 }
 0x6e5   : >> { %3456 = vtanh.f32 %v2004_v11 }
 0x6e6   : >> { %2134 = vmatmul.bf16.gmra.mxu3 %v2042_v3 }
 0x6ea   : >> { %v2005_v46 = vpop.f32.mrf.mxu2 }
 0x6eb   : >> { %v2006_v47 = vadd.f32 %v4914_v39, %v2005_v46  ;;  %v3457_v51 = vpop.eup %3456 }
 0x6ed   : >> { %3458 = vtanh.f32 %v2006_v47 }
 0x6f2   : >> { %v2008_v9 = vpop.f32.mrf.mxu2 }
 0x6f3   : >> { %v3459_v16 = vpop.eup %3458  ;;  %v2009_v50 = vadd.f32 %v4914_v39, %v2008_v9 }
 0x6f4   : >> { %v2043_v49 = vpack.c.bf16 %v3459_v16, %v3457_v51 }
 0x6f5   : >> { %3460 = vtanh.f32 %v2009_v50 }
 0x6f6   : >> { %2139 = vmatmul.bf16.gmra.mxu3 %v2043_v49 }
 0x6fa   : >> { %v2010_v29 = vpop.f32.mrf.mxu2 }
 0x6fb   : >> { %v2011_v14 = vadd.f32 %v4914_v39, %v2010_v29  ;;  %v3461_v53 = vpop.eup %3460 }
 0x6fd   : >> { %3462 = vtanh.f32 %v2011_v14 }
 0x702   : >> { %v2013_v54 = vpop.f32.mrf.mxu2 }
 0x703   : >> { %v3463_v32 = vpop.eup %3462  ;;  %v2014_v58 = vadd.f32 %v4914_v39, %v2013_v54 }
 0x704   : >> { %v2044_v31 = vpack.c.bf16 %v3463_v32, %v3461_v53 }
 0x705   : >> { %3464 = vtanh.f32 %v2014_v58 }
 0x706   : >> { %2144 = vmatmul.bf16.gmra.mxu3 %v2044_v31 }
 0x70a   : >> { %v2015_v59 = vpop.f32.mrf.mxu2 }
 0x70b   : >> { %v2016_v35 = vadd.f32 %v4914_v39, %v2015_v59  ;;  %v3465_v36 = vpop.eup %3464 }
 0x70d   : >> { %3466 = vtanh.f32 %v2016_v35 }
 0x712   : >> { %v2018_v5 = vpop.f32.mrf.mxu2 }
 0x713   : >> { %v3467_v40 = vpop.eup %3466  ;;  %v2019_v25 = vadd.f32 %v4914_v39, %v2018_v5 }
 0x714   : >> { %v2045_v24 = vpack.c.bf16 %v3467_v40, %v3465_v36 }
 0x715   : >> { %3468 = vtanh.f32 %v2019_v25 }
 0x716   : >> { %2149 = vmatmul.bf16.gmra.mxu3 %v2045_v24 }
 0x71a   : >> { %v2020_v42 = vpop.f32.mrf.mxu2 }
 0x71b   : >> { %v2021_v43 = vadd.f32 %v4914_v39, %v2020_v42  ;;  %v3469_v26 = vpop.eup %3468 }
 0x71d   : >> { %3470 = vtanh.f32 %v2021_v43 }
 0x723   : >> { %v3471_v6 = vpop.eup %3470 }
 0x724   : >> { %v2046_v7 = vpack.c.bf16 %v3471_v6, %v3469_v26 }
 0x726   : >> { %2154 = vmatmul.bf16.gmra.mxu3 %v2046_v7 }
 0x739   : >> { %v2120_v8 = vpop.f32.mrf.mxu3 }
 0x73a   : >> { %v4933_v16 = vadd.f32 %v2120_v8, %v4756_v62  }
 0x73c   : >> { %v5167_v10 = vmov %v4933_v16 }
 0x73d   : >> { %2927 = vst [vmem:[%s4345_s21 + $0x180] sm:$0xff] %v5167_v10  ;;  %v5185_v16 = vmov %v5167_v10 }
 0x73e   : > { %2194 = vst [vmem:[%s4056_s22] sm:$0xff] (%p4971_p3), %v5167_v10 }
 0x741   : >> { %v2122_v17 = vpop.f32.mrf.mxu3 }
 0x742   : >> { %v4938_v17 = vadd.f32 %v2122_v17, %v4761_v63  }
 0x744   : >> { %v5168_v52 = vmov %v4938_v17 }
 0x745   : >> { %2928 = vst [vmem:[%s4345_s21 + $0x188] sm:$0xff] %v5168_v52  ;;  %v5184_v17 = vmov %v5168_v52 }
 0x746   : > { %2195 = vst [vmem:[%s4056_s22 + $0x8] sm:$0xff] (%p4971_p3), %v5168_v52 }
 0x749   : >> { %v2125_v39 = vpop.f32.mrf.mxu3 }
 0x74a   : >> { %v2162_v13 = vadd.f32 %v2125_v39, %v4771_v2  }
 0x74c   : >> { %2929 = vst [vmem:[%s4345_s21 + $0x190] sm:$0xff] %v2162_v13 }
 0x74d   : > { %2196 = vst [vmem:[%s4056_s22 + $0x10] sm:$0xff] (%p4971_p3), %v2162_v13 }
 0x751   : >> { %v2127_v28 = vpop.f32.mrf.mxu3 }
 0x752   : >> { %v2163_v15 = vadd.f32 %v2127_v28, %v4776_v41  }
 0x754   : >> { %2930 = vst [vmem:[%s4345_s21 + $0x198] sm:$0xff] %v2163_v15 }
 0x755   : > { %2197 = vst [vmem:[%s4056_s22 + $0x18] sm:$0xff] (%p4971_p3), %v2163_v15 }
 0x759   : >> { %v2130_v62 = vpop.f32.mrf.mxu3 }
 0x75a   : >> { %v2164_v55 = vadd.f32 %v2130_v62, %v4786_v45  }
 0x75c   : >> { %2931 = vst [vmem:[%s4345_s21 + $0x1a0] sm:$0xff] %v2164_v55 }
 0x75d   : > { %2198 = vst [vmem:[%s4056_s22 + $0x20] sm:$0xff] (%p4971_p3), %v2164_v55 }
 0x761   : >> { %v2132_v63 = vpop.f32.mrf.mxu3 }
 0x762   : >> { %v2165_v56 = vadd.f32 %v2132_v63, %v4791_v27  }
 0x764   : >> { %2932 = vst [vmem:[%s4345_s21 + $0x1a8] sm:$0xff] %v2165_v56 }
 0x765   : > { %2199 = vst [vmem:[%s4056_s22 + $0x28] sm:$0xff] (%p4971_p3), %v2165_v56 }
 0x769   : >> { %v2135_v30 = vpop.f32.mrf.mxu3 }
 0x76a   : >> { %v2166_v2 = vadd.f32 %v2135_v30, %v4801_v12  }
 0x76c   : >> { %2933 = vst [vmem:[%s4345_s21 + $0x1b0] sm:$0xff] %v2166_v2 }
 0x76d   : > { %2200 = vst [vmem:[%s4056_s22 + $0x30] sm:$0xff] (%p4971_p3), %v2166_v2 }
 0x771   : >> { %v2137_v33 = vpop.f32.mrf.mxu3 }
 0x772   : >> { %v2167_v41 = vadd.f32 %v2137_v33, %v4806_v57  }
 0x774   : >> { %2934 = vst [vmem:[%s4345_s21 + $0x1b8] sm:$0xff] %v2167_v41 }
 0x775   : > { %2201 = vst [vmem:[%s4056_s22 + $0x38] sm:$0xff] (%p4971_p3), %v2167_v41 }
 0x779   : >> { %v2140_v34 = vpop.f32.mrf.mxu3 }
 0x77a   : >> { %v2168_v45 = vadd.f32 %v2140_v34, %v4816_v18  }
 0x77c   : >> { %2935 = vst [vmem:[%s4345_s21 + $0x1c0] sm:$0xff] %v2168_v45  ;;  %v5177_v24 = vmov %v2168_v45 }
 0x77d   : > { %2202 = vst [vmem:[%s4056_s22 + $0x40] sm:$0xff] (%p4971_p3), %v2168_v45 }
 0x781   : >> { %v2142_v60 = vpop.f32.mrf.mxu3 }
 0x782   : >> { %v2169_v61 = vadd.f32 %v2142_v60, %v4821_v19  }
 0x784   : >> { %2936 = vst [vmem:[%s4345_s21 + $0x1c8] sm:$0xff] %v2169_v61  ;;  %v5176_v25 = vmov %v2169_v61 }
 0x785   : > { %2203 = vst [vmem:[%s4056_s22 + $0x48] sm:$0xff] (%p4971_p3), %v2169_v61 }
 0x789   : >> { %v2145_v27 = vpop.f32.mrf.mxu3 }
 0x78a   : >> { %v2170_v12 = vadd.f32 %v2145_v27, %v4831_v20   ;;  %v5181_v20 = vmov %v2164_v55 }
 0x78c   : >> { %2937 = vst [vmem:[%s4345_s21 + $0x1d0] sm:$0xff] %v2170_v12  ;;  %v5175_v26 = vmov %v2170_v12 }
 0x78d   : > { %2204 = vst [vmem:[%s4056_s22 + $0x50] sm:$0xff] (%p4971_p3), %v2170_v12 }
 0x791   : >> { %v2147_v37 = vpop.f32.mrf.mxu3 }
 0x792   : >> { %v2171_v57 = vadd.f32 %v2147_v37, %v4836_v21   ;;  %v5180_v21 = vmov %v2165_v56 }
 0x794   : >> { %2938 = vst [vmem:[%s4345_s21 + $0x1d8] sm:$0xff] %v2171_v57  ;;  %v5174_v27 = vmov %v2171_v57 }
 0x795   : > { %2205 = vst [vmem:[%s4056_s22 + $0x58] sm:$0xff] (%p4971_p3), %v2171_v57 }
 0x799   : >> { %v2150_v22 = vpop.f32.mrf.mxu3 }
 0x79a   : >> { %v2172_v1 = vadd.f32 %v2150_v22, %v4849_v38   ;;  %v5179_v22 = vmov %v2166_v2 }
 0x79c   : >> { %2939 = vst [vmem:[%s4345_s21 + $0x1e0] sm:$0xff] %v2172_v1  ;;  %v5173_v28 = vmov %v2172_v1 }
 0x79d   : > { %2206 = vst [vmem:[%s4056_s22 + $0x60] sm:$0xff] (%p4971_p3), %v2172_v1 }
 0x7a1   : >> { %v2152_v18 = vpop.f32.mrf.mxu3 }
 0x7a2   : >> { %v2173_v48 = vadd.f32 %v2152_v18, %v4854_v0   ;;  %v5183_v18 = vmov %v2162_v13 }
 0x7a4   : >> { %2940 = vst [vmem:[%s4345_s21 + $0x1e8] sm:$0xff] %v2173_v48  ;;  %v5172_v29 = vmov %v2173_v48 }
 0x7a5   : > { %2207 = vst [vmem:[%s4056_s22 + $0x68] sm:$0xff] (%p4971_p3), %v2173_v48 }
 0x7a9   : >> { %v2155_v19 = vpop.f32.mrf.mxu3 }
 0x7aa   : >> { %v2174_v3 = vadd.f32 %v2155_v19, %v4861_v4   ;;  %v5182_v19 = vmov %v2163_v15 }
 0x7ac   : >> { %2941 = vst [vmem:[%s4345_s21 + $0x1f0] sm:$0xff] %v2174_v3  ;;  %v5171_v30 = vmov %v2174_v3 }
 0x7ad   : > { %2208 = vst [vmem:[%s4056_s22 + $0x70] sm:$0xff] (%p4971_p3), %v2174_v3 }
 0x7b0   : > { %424 = sbr.rel (!%p4971_p3) target bundleno = 96 (0x60), region = 134 }
 0x7b1   : >> { %v2157_v23 = vpop.f32.mrf.mxu3 }
 0x7b2   : >> { %v2175_v11 = vadd.f32 %v2157_v23, %v4866_v44   ;;  %v5178_v23 = vmov %v2167_v41 }
 0x7b4   : >> { %2942 = vst [vmem:[%s4345_s21 + $0x1f8] sm:$0xff] %v2175_v11  ;;  %v5170_v31 = vmov %v2175_v11 }
 0x7b5   : > { %2209 = vst [vmem:[%s4056_s22 + $0x78] sm:$0xff] %v2175_v11 }
 0x7b6   : > { %s5186_s2 = sld [smem:[#allocation19_spill]]  ;;  %s2946_s14 = sshll.u32 %s3744_s30, 8 }
 0x7b7   : > { %s2243_s13 = sshll.u32 %s354_s19, 4  ;;  %s5188_s7 = sld [smem:[#allocation31_spill]]  ;;  %s2244_s13 = int_to_ptr.vmem [resolvable:$true] %s2243_s13 }
 0x7b8   : > { %s3834_s21 = smov 2048   ;;  %s3835_s0 = smov 4096  }
 0x7b9   : > { %3065 = sst [smem:[#allocation12]] (%p3965_p10), %s3834_s21  ;;  %s3836_s30 = smov 16  }
 0x7ba   : > { %3066 = sst [smem:[#allocation12 + $0x1]] (%p3965_p10), %s3835_s0  ;;  %s3837_s16 = smov 128  }
 0x7bb   : > { %3067 = sst [smem:[#allocation12 + $0x2]] (%p3965_p10), %s3836_s30  ;;  %s3838_s19 = smov 8  }
 0x7bc   : > { %s2945_s12 = sshll.u32 %s5186_s2, 4  ;;  %3068 = sst [smem:[#allocation12 + $0x3]] (%p3965_p10), %s3837_s16 }
 0x7bd   : > { %s2230_s20 = sadd.s32 %s2946_s14, %s2945_s12  ;;  %3069 = sst [smem:[#allocation12 + $0x4]] (%p3965_p10), %s3837_s16 }
 0x7be   : > { %s2947_s4 = sshll.u32 %s2230_s20, 3  ;;  %3070 = sst [smem:[#allocation12 + $0x5]] (%p3965_p10), %s3838_s19 }
 0x7bf   : > { %s2232_s18 = scalar_lea.hbm %s5188_s7, %s2947_s4  ;;  %s3839_s12 = smov [#allocation11]  }
 0x7c0   : > { %s2245_s17 = sshll.u32 %s2232_s18, 4  ;;  %s3840_s14 = smov 0   ;;  %s2246_s17 = int_to_ptr.hbm [resolvable:$true] %s2245_s17 }
 0x7c1   : > { %3071 = dma.general (%p3965_p10), %s2244_s13, 16384, %s2246_s17, %s2211_s15, %s3839_s12, [#allocation12], %s3840_s14, 0  }
 0x7c2   : > { %s3054_s20 = sshll.u32 %s5186_s2, 7  ;;  %s2273_s0 = sshll.u32 %s4056_s22, 4  ;;  %s2274_s0 = int_to_ptr.vmem [resolvable:$true] %s2273_s0 }
 0x7c3   : > { %s5190_s24 = sld [smem:[#allocation32_spill]] }
 0x7c9   : > { %s5191_s7 = smov %s5190_s24  ;;  %s2272_s18 = scalar_lea.hbm %s5190_s24, %s3054_s20 }
 0x7ca   : > { %s2275_s30 = sshll.u32 %s2272_s18, 4  ;;  %s3582_s13 = scalar_lea.hbm %s5191_s7, 256  ;;  %s2276_s30 = int_to_ptr.hbm [resolvable:$true] %s2275_s30 }
 0x7cb   : > { %s3576_s16 = sshra.s32 %s2276_s30, 4  ;;  %s3577_s16 = int_to_ptr.hbm [resolvable:$true] %s3576_s16 }
 0x7cc   : > { %s3578_s1 = scalar_lea.hbm %s3577_s16, 128  ;;  %p3583_p10 = scmp.lt.s32.totalorder %s3577_s16, %s5191_s7 }
 0x7cd   : > { %p3579_p2 = scmp.ne.s32.totalorder %s3577_s16, %s3578_s1  ;;  %p3584_p8 = scmp.lt.s32.totalorder %s3582_s13, %s3578_s1 }
 0x7cf   : > { %p3580_p7 = pnand %p3579_p2, %p3969_p11  ;;  %p3585_p4 = por %p3584_p8, %p3583_p10 }
 0x7d1   : > { %p3581_p6 = pneg %p3580_p7 }
 0x7d3   : > { %p3586_p9 = pnand %p3585_p4, %p3581_p6 }
 0x7d5   : > { %3589 = shalt.err (!%p3586_p9)
}
 0x7d6   : > { %s3841_s17 = smov 128   ;;  %s3842_s19 = smov 8  }
 0x7d7   : > { %s5192_s12 = scalar_lea.sflag [#allocation10], %s4035_s27 }
 0x7d8   : > { %3072 = dma.vmem_to_hbm [thread:$0]  (%p3969_p11), %s2274_s0, 2048, %s2276_s30, %s5192_s12, %s3841_s17, %s3841_s17, %s3842_s19  }
 0x7d9 PF: > { %s5193_s14 = sld [smem:[#allocation21_spill]] }
 0x7da   : > { %s5194_s20 = sld [smem:[#allocation17_spill]] }
 0x7df   : > { %p3098_p1 = scmp.ge.s32.totalorder %s5193_s14, 2 }
 0x7e0   : > { %s2290_s6 = sand.u32 1, %s5194_s20  }
 0x7e1   : > { %p3087_p0 = pnand %p3098_p1, %p3973_p12  ;;  %s2291_s1 = scalar_lea.sflag [#allocation4], %s2290_s6 }
 0x7e3   : > { %p3088_p5 = pneg %p3087_p0 }
 0x7e5   : > { %3711 = dma.done.wait (%p3088_p5), %s2291_s1, 16384  }
 0x7e6   : > { %3713 = vsyncadd (%p3088_p5), %s2291_s1, 4294950912  ;;  %s5196_s24 = sld [smem:[#allocation18_spill]]  ;;  %p3090_p3 = pnand %p3098_p1, %p3977_p13 }
 0x7e8   : > { %p3091_p2 = pneg %p3090_p3 }
 0x7ec   : > { %s2300_s16 = sand.u32 1, %s5196_s24  }
 0x7ed   : > { %s2301_s27 = scalar_lea.sflag [#allocation10], %s2300_s16 }
 0x7ee   : > { %3715 = dma.done.wait (%p3091_p2), %s2301_s27, 2048  }
 0x7ef   : > { %3717 = vsyncadd (%p3091_p2), %s2301_s27, 4294965248  ;;  %s28_s21 = sadd.s32 1, %s5193_s14   ;;  %s5198_s30 = sld [smem:[#allocation20_spill]] }
 0x7f0   : > { %p25_p11 = scmp.ge.s32.totalorder %s28_s21, 6   ;;  %s5199_s0 = sld [smem:[#allocation26_spill]] }
 0x7f1   : > { %s5200_s24 = smov %s3724_s25  ;;  %s5201_s25 = smov %s3728_s26 }
 0x7f2   : > { %s5202_s26 = smov %s4028_s8  ;;  %s5203_s27 = smov %s3736_s28 }
 0x7f3   : > { %s5204_s28 = smov %s3740_s29  ;;  %s5205_s29 = smov %s4023_s9 }
 0x7f4   : > { %s5206_s8 = smov %s3756_s10  ;;  %s5208_s10 = smov %s5215_s11 }
 0x7f5   : > { %s5209_s11 = smov %s28_s21  ;;  %27 = sbr.rel (!%p25_p11) target bundleno = 19 (0x13), region = 145 }
 0x7f6   : > { %s5207_s9 = smov %s5199_s0 }
 0x7fa   :  { %2307 = vsyncpa [#allocation3], 1 }
 0x7fb   :  { %2309 = vsyncpa [#allocation3 + $0x1], 1 }
 0x7fc   :  { %2310 = vsyncpa [#allocation6], 1 }
 0x7fd   :  { %2311 = vsyncpa [#allocation4], 1 }
 0x7fe   :  { %2313 = vsyncpa [#allocation4 + $0x1], 1 }
 0x7ff   :  { %2314 = vsyncpa [#allocation10], 1 }
 0x800   :  { %2316 = vsyncpa [#allocation10 + $0x1], 1 }

</bundles_post_ra>
